<compile_context>
chip_gen: v6e
topology: v6e:2x2x1
jax: 0.10.0
libtpu: 0.0.40
codegen_flags: <defaults>
</compile_context>

<pallas_src>
import jax
import jax.numpy as jnp
import numpy as np
from jax.experimental import pallas as pl
from jax.experimental.pallas import tpu as pltpu

BN_EPS = 1e-5
LANE = 128
SUBLANE = 8


def _round_up(x, m):
    return (x + m - 1) // m * m


# ----------------------------------------------------------------------------- kernel
def mlp_kernel(x_ref, w_in_ref, b_in_ref, w_h_ref, b_h_ref,
               w_out_ref, b_out_ref, o_ref):
    # Input linear: (tb, I) @ (I, Hp); bf16 operands, f32 accumulation, f32 bias.
    h = jnp.dot(x_ref[...].astype(jnp.bfloat16), w_in_ref[...],
                preferred_element_type=jnp.float32) + b_in_ref[...]

    # Three hidden blocks: eval-mode BN is folded into w_h/b_h -> Linear + ReLU only.
    for i in range(3):
        h = jnp.maximum(
            jnp.dot(h.astype(jnp.bfloat16), w_h_ref[i],
                    preferred_element_type=jnp.float32) + b_h_ref[i:i + 1, :],
            0.0)
        # Dropout(0.5): identity in eval mode.

    # Output linear: (tb, Hp) @ (Hp, O) + (1, O); store in f32 (module dtype).
    o_ref[...] = (jnp.dot(h.astype(jnp.bfloat16), w_out_ref[...],
                          preferred_element_type=jnp.float32)
                  + b_out_ref[...]).astype(o_ref.dtype)


# ------------------------------------------------------------------ parameter folding
def prepare_params(raw_params):
    """Fold eval-mode BatchNorm into the hidden Linears, pad only the hidden dim to
    a lane multiple, and cast weight matrices to bf16. Done once (amortized)."""
    (w_in, b_in, bn_g, bn_b, bn_m, bn_v, w_h, b_h, w_out, b_out) = raw_params
    I, H = w_in.shape
    O = w_out.shape[1]

    # BN(eval):  y = (h - mean) * rsqrt(var+eps) * gamma + beta = h*a + c
    inv_std = jax.lax.rsqrt(bn_v + BN_EPS)                  # (3, H)
    a = bn_g * inv_std                                      # (3, H)
    c = bn_b - bn_m * a                                     # (3, H)
    # (h*a + c) @ W + b == h @ (a[:,None]*W) + (c @ W + b)   (fold in f32)
    w_h_f = a[:, :, None] * w_h                             # (3, H, H)
    b_h_f = jnp.einsum('ih,iho->io', c, w_h) + b_h          # (3, H)

    Hp = _round_up(H, LANE)                                 # 100 -> 128
    w_in_p = jnp.zeros((I, Hp), jnp.bfloat16).at[:, :H].set(w_in.astype(jnp.bfloat16))
    b_in_p = jnp.zeros((1, Hp), jnp.float32).at[:, :H].set(b_in.reshape(1, H))
    w_h_p = jnp.zeros((3, Hp, Hp), jnp.bfloat16).at[:, :H, :H].set(
        w_h_f.astype(jnp.bfloat16))
    b_h_p = jnp.zeros((3, Hp), jnp.float32).at[:, :H].set(b_h_f)
    w_out_p = jnp.zeros((Hp, O), jnp.bfloat16).at[:H, :].set(w_out.astype(jnp.bfloat16))
    b_out_p = b_out.reshape(1, O).astype(jnp.float32)
    # Padded hidden lanes stay exactly 0 through every layer (zero weights + zero
    # folded biases + ReLU), so no output correction is needed.
    return (w_in_p, b_in_p, w_h_p, b_h_p, w_out_p, b_out_p)


# --------------------------------------------------------------------------- wrapper
def _pick_tb(B, max_tb=512):
    """Sublane-aligned batch tile with minimal row padding and an even tile count
    (so the 'parallel' batch axis keeps both v7x TensorCores busy)."""
    if B <= SUBLANE:
        return SUBLANE
    n_tiles = max(2, -(-B // max_tb))
    n_tiles += n_tiles % 2
    return _round_up(-(-B // n_tiles), SUBLANE)


def mlp_forward(x, folded_params, tb=None):
    w_in_p, b_in_p, w_h_p, b_h_p, w_out_p, b_out_p = folded_params
    B, I = x.shape
    assert I == w_in_p.shape[0], "input feature dim mismatch"
    O = w_out_p.shape[1]

    if tb is None:
        tb = _pick_tb(B)
    tb = min(tb, _round_up(B, SUBLANE))
    B_pad = _round_up(B, tb)
    # Row padding only when B is not already a tile multiple (no feature padding).
    x_in = x if B_pad == B else jnp.zeros((B_pad, I), x.dtype).at[:B].set(x)

    out = pl.pallas_call(
        mlp_kernel,
        out_shape=jax.ShapeDtypeStruct((B_pad, O), jnp.float32),
        grid=(B_pad // tb,),
        in_specs=[
            pl.BlockSpec((tb, I), lambda i: (i, 0)),         # x: batch-tiled, ragged I ok
            pl.BlockSpec(w_in_p.shape, lambda i: (0, 0)),    # weights: VMEM-resident
            pl.BlockSpec(b_in_p.shape, lambda i: (0, 0)),
            pl.BlockSpec(w_h_p.shape, lambda i: (0, 0, 0)),
            pl.BlockSpec(b_h_p.shape, lambda i: (0, 0)),
            pl.BlockSpec(w_out_p.shape, lambda i: (0, 0)),
            pl.BlockSpec(b_out_p.shape, lambda i: (0, 0)),
        ],
        out_specs=pl.BlockSpec((tb, O), lambda i: (i, 0)),
        compiler_params=pltpu.CompilerParams(
            dimension_semantics=("parallel",)),
    )(x_in, w_in_p, b_in_p, w_h_p, b_h_p, w_out_p, b_out_p)
    return out if B_pad == B else out[:B]


# ------------------------------------------------------------------- params + reference
def init_params(key, num_input=721, num_hidden=100, num_output=721):
    """Deterministic init mirroring MLP._initialize_weights():
       Linear: weight ~ U(0,1), bias = 0;  BatchNorm1d: gamma = 0, beta = 0
       (running_mean = 0, running_var = 1 as freshly initialized)."""
    k_in, k_h, k_out = jax.random.split(key, 3)
    w_in = jax.random.uniform(k_in, (num_input, num_hidden), jnp.float32)
    b_in = jnp.zeros((num_hidden,), jnp.float32)
    w_h = jax.random.uniform(k_h, (3, num_hidden, num_hidden), jnp.float32)
    b_h = jnp.zeros((3, num_hidden), jnp.float32)
    w_out = jax.random.uniform(k_out, (num_hidden, num_output), jnp.float32)
    b_out = jnp.zeros((num_output,), jnp.float32)
    bn_g = jnp.zeros((3, num_hidden), jnp.float32)
    bn_b = jnp.zeros((3, num_hidden), jnp.float32)
    bn_m = jnp.zeros((3, num_hidden), jnp.float32)
    bn_v = jnp.ones((3, num_hidden), jnp.float32)
    return (w_in, b_in, bn_g, bn_b, bn_m, bn_v, w_h, b_h, w_out, b_out)


def init_generic_params(key, num_input=721, num_hidden=100, num_output=721):
    """Generic non-trivial params (gamma != 0, nonzero biases/stats) to verify the
    BN-folding + padding math end-to-end (not the module's own init)."""
    ks = jax.random.split(key, 10)
    s = 0.05
    w_in = jax.random.normal(ks[0], (num_input, num_hidden), jnp.float32) * s
    b_in = jax.random.normal(ks[1], (num_hidden,), jnp.float32) * s
    w_h = jax.random.normal(ks[2], (3, num_hidden, num_hidden), jnp.float32) * s
    b_h = jax.random.normal(ks[3], (3, num_hidden), jnp.float32) * s
    w_out = jax.random.normal(ks[4], (num_hidden, num_output), jnp.float32) * s
    b_out = jax.random.normal(ks[5], (num_output,), jnp.float32) * s
    bn_g = jax.random.uniform(ks[6], (3, num_hidden), jnp.float32, 0.5, 1.5)
    bn_b = jax.random.normal(ks[7], (3, num_hidden), jnp.float32) * 0.1
    bn_m = jax.random.normal(ks[8], (3, num_hidden), jnp.float32) * 0.1
    bn_v = jax.random.uniform(ks[9], (3, num_hidden), jnp.float32, 0.5, 1.5)
    return (w_in, b_in, bn_g, bn_b, bn_m, bn_v, w_h, b_h, w_out, b_out)


def mlp_reference(x, raw_params):
    """Unfused, unpadded, full-f32 JAX reference of the PyTorch module in eval mode."""
    (w_in, b_in, bn_g, bn_b, bn_m, bn_v, w_h, b_h, w_out, b_out) = raw_params
    h = x @ w_in + b_in
    for i in range(3):
        h = (h - bn_m[i]) * jax.lax.rsqrt(bn_v[i] + BN_EPS) * bn_g[i] + bn_b[i]
        h = jnp.maximum(h @ w_h[i] + b_h[i], 0.0)
    return h @ w_out + b_out


if __name__ == "__main__":
    key = jax.random.PRNGKey(0)
    k_x, k_p1, k_p2, k_x2 = jax.random.split(key, 4)

    B, NUM_INPUT, NUM_HIDDEN, NUM_OUTPUT = 256, 721, 100, 721
    x = jax.random.normal(k_x, (B, NUM_INPUT), jnp.float32)

    # 1) Module-faithful init (gamma=0 => hidden path collapses to zeros; exact).
    raw1 = init_params(k_p1, NUM_INPUT, NUM_HIDDEN, NUM_OUTPUT)
    folded1 = prepare_params(raw1)
    out1 = jax.block_until_ready(mlp_forward(x, folded1))
    ref1 = mlp_reference(x, raw1)
    np.testing.assert_allclose(np.asarray(out1), np.asarray(ref1),
                               rtol=1e-4, atol=1e-4)
    assert out1.shape == (B, NUM_OUTPUT)

    # 2) Generic params: verifies BN folding + bf16 weight path end-to-end.
    #    Tolerances loosened for bf16 operands (accumulation stays f32).
    raw2 = init_generic_params(k_p2, NUM_INPUT, NUM_HIDDEN, NUM_OUTPUT)
    folded2 = prepare_params(raw2)
    out2 = jax.block_until_ready(mlp_forward(x, folded2))
    ref2 = mlp_reference(x, raw2)
    np.testing.assert_allclose(np.asarray(out2), np.asarray(ref2),
                               rtol=2e-2, atol=2e-2)

    # 3) Ragged batch (B=52): exercises minimal row padding + row slice path.
    x_small = jax.random.normal(k_x2, (52, NUM_INPUT), jnp.float32)
    out3 = jax.block_until_ready(mlp_forward(x_small, folded2))
    ref3 = mlp_reference(x_small, raw2)
    np.testing.assert_allclose(np.asarray(out3), np.asarray(ref3),
                               rtol=2e-2, atol=2e-2)
    assert out3.shape == (52, NUM_OUTPUT)

    print("KERNEL_OK")
</pallas_src>

<mosaic_0001>
module attributes {stable_mosaic.version = 11 : i64} {
  func.func @mlp_kernel(%arg0: i32, %arg1: memref<128x721xf32, #tpu.memory_space<vmem>>, %arg2: memref<721x128xbf16, #tpu.memory_space<vmem>>, %arg3: memref<1x128xf32, #tpu.memory_space<vmem>>, %arg4: memref<3x128x128xbf16, #tpu.memory_space<vmem>>, %arg5: memref<3x128xf32, #tpu.memory_space<vmem>>, %arg6: memref<128x721xbf16, #tpu.memory_space<vmem>>, %arg7: memref<1x721xf32, #tpu.memory_space<vmem>>, %arg8: memref<128x721xf32, #tpu.memory_space<vmem>>) attributes {dimension_semantics = [#tpu.dimension_semantics<parallel>], iteration_bounds = array<i64: 2>, scalar_prefetch = 0 : i64, scratch_operands = 0 : i64, tpu.core_type = #tpu.core_type<tc>, window_params = [{transform_indices = @transform_0, window_bounds = array<i64: 128, 721>}, {pipeline_mode = #tpu.pipeline_mode<synchronous>, transform_indices = @transform_1, window_bounds = array<i64: 721, 128>}, {pipeline_mode = #tpu.pipeline_mode<synchronous>, transform_indices = @transform_2, window_bounds = array<i64: 1, 128>}, {pipeline_mode = #tpu.pipeline_mode<synchronous>, transform_indices = @transform_3, window_bounds = array<i64: 3, 128, 128>}, {pipeline_mode = #tpu.pipeline_mode<synchronous>, transform_indices = @transform_4, window_bounds = array<i64: 3, 128>}, {pipeline_mode = #tpu.pipeline_mode<synchronous>, transform_indices = @transform_5, window_bounds = array<i64: 128, 721>}, {pipeline_mode = #tpu.pipeline_mode<synchronous>, transform_indices = @transform_6, window_bounds = array<i64: 1, 721>}, {transform_indices = @transform_7, window_bounds = array<i64: 128, 721>}]} {
    %c0 = arith.constant 0 : index
    %c0_0 = arith.constant 0 : index
    %0 = vector.load %arg1[%c0, %c0_0] : memref<128x721xf32, #tpu.memory_space<vmem>>, vector<128x721xf32>
    %1 = arith.truncf %0 : vector<128x721xf32> to vector<128x721xbf16>
    %c0_1 = arith.constant 0 : index
    %c0_2 = arith.constant 0 : index
    %2 = vector.load %arg2[%c0_1, %c0_2] : memref<721x128xbf16, #tpu.memory_space<vmem>>, vector<721x128xbf16>
    %cst = arith.constant dense<0.000000e+00> : vector<128x128xf32>
    %3 = tpu.matmul %1, %2, %cst {dimension_numbers = #tpu.dot_dimension_numbers<[1], [0], [0], [1], [0, 0, 1, 1], [], []>} : vector<128x721xbf16>, vector<721x128xbf16>, vector<128x128xf32> -> vector<128x128xf32>
    %c0_3 = arith.constant 0 : index
    %c0_4 = arith.constant 0 : index
    %4 = vector.load %arg3[%c0_3, %c0_4] : memref<1x128xf32, #tpu.memory_space<vmem>>, vector<1x128xf32>
    %5 = vector.broadcast %4 : vector<1x128xf32> to vector<128x128xf32>
    %6 = arith.addf %3, %5 : vector<128x128xf32>
    %7 = arith.truncf %6 : vector<128x128xf32> to vector<128x128xbf16>
    %c0_5 = arith.constant 0 : index
    %c0_6 = arith.constant 0 : index
    %c0_7 = arith.constant 0 : index
    %8 = vector.load %arg4[%c0_5, %c0_6, %c0_7] : memref<3x128x128xbf16, #tpu.memory_space<vmem>>, vector<1x128x128xbf16>
    %9 = vector.shape_cast %8 : vector<1x128x128xbf16> to vector<128x128xbf16>
    %cst_8 = arith.constant dense<0.000000e+00> : vector<128x128xf32>
    %10 = tpu.matmul %7, %9, %cst_8 {dimension_numbers = #tpu.dot_dimension_numbers<[1], [0], [0], [1], [0, 0, 1, 1], [], []>} : vector<128x128xbf16>, vector<128x128xbf16>, vector<128x128xf32> -> vector<128x128xf32>
    %c0_9 = arith.constant 0 : index
    %c0_10 = arith.constant 0 : index
    %11 = vector.load %arg5[%c0_9, %c0_10] : memref<3x128xf32, #tpu.memory_space<vmem>>, vector<1x128xf32>
    %12 = vector.broadcast %11 : vector<1x128xf32> to vector<128x128xf32>
    %13 = arith.addf %10, %12 : vector<128x128xf32>
    %cst_11 = arith.constant 0.000000e+00 : f32
    %14 = vector.broadcast %cst_11 : f32 to vector<128x128xf32>
    %15 = arith.maximumf %13, %14 : vector<128x128xf32>
    %16 = arith.truncf %15 : vector<128x128xf32> to vector<128x128xbf16>
    %c1 = arith.constant 1 : index
    %c0_12 = arith.constant 0 : index
    %c0_13 = arith.constant 0 : index
    %17 = vector.load %arg4[%c1, %c0_12, %c0_13] : memref<3x128x128xbf16, #tpu.memory_space<vmem>>, vector<1x128x128xbf16>
    %18 = vector.shape_cast %17 : vector<1x128x128xbf16> to vector<128x128xbf16>
    %cst_14 = arith.constant dense<0.000000e+00> : vector<128x128xf32>
    %19 = tpu.matmul %16, %18, %cst_14 {dimension_numbers = #tpu.dot_dimension_numbers<[1], [0], [0], [1], [0, 0, 1, 1], [], []>} : vector<128x128xbf16>, vector<128x128xbf16>, vector<128x128xf32> -> vector<128x128xf32>
    %c1_15 = arith.constant 1 : index
    %c0_16 = arith.constant 0 : index
    %20 = vector.load %arg5[%c1_15, %c0_16] : memref<3x128xf32, #tpu.memory_space<vmem>>, vector<1x128xf32>
    %21 = vector.broadcast %20 : vector<1x128xf32> to vector<128x128xf32>
    %22 = arith.addf %19, %21 : vector<128x128xf32>
    %cst_17 = arith.constant 0.000000e+00 : f32
    %23 = vector.broadcast %cst_17 : f32 to vector<128x128xf32>
    %24 = arith.maximumf %22, %23 : vector<128x128xf32>
    %25 = arith.truncf %24 : vector<128x128xf32> to vector<128x128xbf16>
    %c2 = arith.constant 2 : index
    %c0_18 = arith.constant 0 : index
    %c0_19 = arith.constant 0 : index
    %26 = vector.load %arg4[%c2, %c0_18, %c0_19] : memref<3x128x128xbf16, #tpu.memory_space<vmem>>, vector<1x128x128xbf16>
    %27 = vector.shape_cast %26 : vector<1x128x128xbf16> to vector<128x128xbf16>
    %cst_20 = arith.constant dense<0.000000e+00> : vector<128x128xf32>
    %28 = tpu.matmul %25, %27, %cst_20 {dimension_numbers = #tpu.dot_dimension_numbers<[1], [0], [0], [1], [0, 0, 1, 1], [], []>} : vector<128x128xbf16>, vector<128x128xbf16>, vector<128x128xf32> -> vector<128x128xf32>
    %c2_21 = arith.constant 2 : index
    %c0_22 = arith.constant 0 : index
    %29 = vector.load %arg5[%c2_21, %c0_22] : memref<3x128xf32, #tpu.memory_space<vmem>>, vector<1x128xf32>
    %30 = vector.broadcast %29 : vector<1x128xf32> to vector<128x128xf32>
    %31 = arith.addf %28, %30 : vector<128x128xf32>
    %cst_23 = arith.constant 0.000000e+00 : f32
    %32 = vector.broadcast %cst_23 : f32 to vector<128x128xf32>
    %33 = arith.maximumf %31, %32 : vector<128x128xf32>
    %34 = arith.truncf %33 : vector<128x128xf32> to vector<128x128xbf16>
    %c0_24 = arith.constant 0 : index
    %c0_25 = arith.constant 0 : index
    %35 = vector.load %arg6[%c0_24, %c0_25] : memref<128x721xbf16, #tpu.memory_space<vmem>>, vector<128x721xbf16>
    %cst_26 = arith.constant dense<0.000000e+00> : vector<128x721xf32>
    %36 = tpu.matmul %34, %35, %cst_26 {dimension_numbers = #tpu.dot_dimension_numbers<[1], [0], [0], [1], [0, 0, 1, 1], [], []>} : vector<128x128xbf16>, vector<128x721xbf16>, vector<128x721xf32> -> vector<128x721xf32>
    %c0_27 = arith.constant 0 : index
    %c0_28 = arith.constant 0 : index
    %37 = vector.load %arg7[%c0_27, %c0_28] : memref<1x721xf32, #tpu.memory_space<vmem>>, vector<1x721xf32>
    %38 = vector.broadcast %37 : vector<1x721xf32> to vector<128x721xf32>
    %39 = arith.addf %36, %38 : vector<128x721xf32>
    %c0_29 = arith.constant 0 : index
    %c0_30 = arith.constant 0 : index
    %40 = vector.load %arg8[%c0_29, %c0_30] : memref<128x721xf32, #tpu.memory_space<vmem>>, vector<128x721xf32>
    tpu.vector_store %arg8[%c0_29, %c0_30], %39 {strides = array<i32>} : memref<128x721xf32, #tpu.memory_space<vmem>>, vector<128x721xf32>,
    return
  }
  func.func @transform_0(%arg0: i32) -> (i32, i32) {
    %c0_i32 = arith.constant 0 : i32
    %c0_i32_0 = arith.constant 0 : i32
    return %arg0, %c0_i32 : i32, i32
  }
  func.func @transform_1(%arg0: i32) -> (i32, i32) {
    %c0_i32 = arith.constant 0 : i32
    %c0_i32_0 = arith.constant 0 : i32
    %c0_i32_1 = arith.constant 0 : i32
    return %c0_i32, %c0_i32_0 : i32, i32
  }
  func.func @transform_2(%arg0: i32) -> (i32, i32) {
    %c0_i32 = arith.constant 0 : i32
    %c0_i32_0 = arith.constant 0 : i32
    %c0_i32_1 = arith.constant 0 : i32
    return %c0_i32, %c0_i32_0 : i32, i32
  }
  func.func @transform_3(%arg0: i32) -> (i32, i32, i32) {
    %c0_i32 = arith.constant 0 : i32
    %c0_i32_0 = arith.constant 0 : i32
    %c0_i32_1 = arith.constant 0 : i32
    %c0_i32_2 = arith.constant 0 : i32
    return %c0_i32, %c0_i32_0, %c0_i32_1 : i32, i32, i32
  }
  func.func @transform_4(%arg0: i32) -> (i32, i32) {
    %c0_i32 = arith.constant 0 : i32
    %c0_i32_0 = arith.constant 0 : i32
    %c0_i32_1 = arith.constant 0 : i32
    return %c0_i32, %c0_i32_0 : i32, i32
  }
  func.func @transform_5(%arg0: i32) -> (i32, i32) {
    %c0_i32 = arith.constant 0 : i32
    %c0_i32_0 = arith.constant 0 : i32
    %c0_i32_1 = arith.constant 0 : i32
    return %c0_i32, %c0_i32_0 : i32, i32
  }
  func.func @transform_6(%arg0: i32) -> (i32, i32) {
    %c0_i32 = arith.constant 0 : i32
    %c0_i32_0 = arith.constant 0 : i32
    %c0_i32_1 = arith.constant 0 : i32
    return %c0_i32, %c0_i32_0 : i32, i32
  }
  func.func @transform_7(%arg0: i32) -> (i32, i32) {
    %c0_i32 = arith.constant 0 : i32
    %c0_i32_0 = arith.constant 0 : i32
    return %arg0, %c0_i32 : i32, i32
  }
}

</mosaic_0001>

<bundles_post_ra>
// kernel: tpu_custom_call.1
= control target key start
LH: loop header
LB: loop body
LE: loop exit
PB: predicated region body
PF: predicated region fallthrough
CT: control target
= control target key end

     0   :  { %s3180_s24 = smov 0   ;;  %s4138_s0 = inlined_call_operand.vmem [shape: f32[256,721], index: 0, kind: input, shape index: {}]   ;;  %s4139_s1 = inlined_call_operand.vmem [shape: bf16[721,128], index: 1, kind: input, shape index: {}]   ;;  %s4140_s2 = inlined_call_operand.vmem [shape: f32[1,128], index: 2, kind: input, shape index: {}]   ;;  %s4141_s3 = inlined_call_operand.vmem [shape: bf16[3,128,128], index: 3, kind: input, shape index: {}]   ;;  %s4142_s4 = inlined_call_operand.vmem [shape: f32[3,128], index: 4, kind: input, shape index: {}]   ;;  %s4143_s5 = inlined_call_operand.vmem [shape: bf16[128,721], index: 5, kind: input, shape index: {}]   ;;  %s4144_s6 = inlined_call_operand.vmem [shape: f32[1,721], index: 6, kind: input, shape index: {}]   ;;  %s4145_s7 = inlined_call_operand.vmem [shape: f32[256,721], index: 7, kind: output, shape index: {}]  }
   0x1 LB: > { %s2518_s25 = sadd.s32 4294967295, %s3137_s24   ;;  %p2522_p0 = scmp.ge.s32.totalorder %s3137_s24, 1  ;;  %s3137_s24 = sphi %s3180_s24, %s17_s24  }
   0x2   : > { %p239_p1 = scmp.lt.s32.totalorder %s3137_s24, 3 }
   0x4   : > { %p240_p2 = pnand %p2522_p0, %p239_p1 }
   0x6   : > { %243 = sbr.rel (%p240_p2) target bundleno = 1240 (0x4d8), region = 48 }
   0xb   : > { %v2989_v0 = vld [vmem:[%s4139_s1 + $0x78] sm:$0xff]   ;;  %v2993_v4 = vld [vmem:[%s4139_s1 + $0x70] sm:$0xff]   ;;  %v2997_v8 = vld [vmem:[%s4139_s1 + $0x68] sm:$0xff]   ;;  %s2523_s10 = sshll.u32 %s2518_s25, 4  ;;  %v4146_v36 = vmov 0   ;;  %vm828_vm0 = vcmask 1040384  }
   0xc   : > { %v2990_v1 = vld [vmem:[%s4139_s1 + $0x38] sm:$0xff]   ;;  %2691 = vmatprep.subr.bf16.mxu0 %v2989_v0  ;;  %v2994_v5 = vld [vmem:[%s4139_s1 + $0x30] sm:$0xff]   ;;  %v2998_v9 = vld [vmem:[%s4139_s1 + $0x28] sm:$0xff]   ;;  %p274_p3 = scmp.lt.s32.totalorder %s2523_s10, 31  ;;  %vm803_vm1 = vcmask 662528  }
   0xd   : > { %v2991_v2 = vld [vmem:[%s4139_s1 + $0xf8] sm:$0xff]   ;;  %2692 = vmatpush3.bf16.msra.mxu0 %v2990_v1  ;;  %v2995_v6 = vld [vmem:[%s4139_s1 + $0xf0] sm:$0xff]   ;;  %v2999_v10 = vld [vmem:[%s4139_s1 + $0xe8] sm:$0xff]  }
   0xe   : > { %v2992_v3 = vld [vmem:[%s4139_s1 + $0xb8] sm:$0xff]   ;;  %2755 = vmatprep.subr.bf16.mxu1 %v2991_v2  ;;  %2693 = vmatprep.subr.bf16.mxu0 %v2993_v4  ;;  %v2996_v7 = vld [vmem:[%s4139_s1 + $0xb0] sm:$0xff]   ;;  %v3000_v11 = vld [vmem:[%s4139_s1 + $0xa8] sm:$0xff]   ;;  %s4154_s10 = smov (!%p274_p3, %s2523_s10), 31 }
   0xf   : > { %2756 = vmatpush3.bf16.msra.mxu1 %v2992_v3  ;;  %v3001_v12 = vld [vmem:[%s4139_s1 + $0x60] sm:$0xff]   ;;  %v3005_v16 = vld [vmem:[%s4139_s1 + $0x58] sm:$0xff]   ;;  %v3009_v20 = vld [vmem:[%s4139_s1 + $0x50] sm:$0xff]   ;;  %s2979_s12 = smul.u32 48, %s4154_s10 }
  0x10   : > { %2757 = vmatprep.subr.bf16.mxu1 %v2995_v6  ;;  %v3002_v13 = vld [vmem:[%s4139_s1 + $0x20] sm:$0xff]   ;;  %v3006_v17 = vld [vmem:[%s4139_s1 + $0x18] sm:$0xff]   ;;  %v3010_v21 = vld [vmem:[%s4139_s1 + $0x10] sm:$0xff]  }
  0x11   : > { %2694 = vmatpush3.bf16.msra.mxu0 %v2994_v5  ;;  %v3003_v14 = vld [vmem:[%s4139_s1 + $0xe0] sm:$0xff]   ;;  %v3007_v18 = vld [vmem:[%s4139_s1 + $0xd8] sm:$0xff]   ;;  %v3011_v22 = vld [vmem:[%s4139_s1 + $0xd0] sm:$0xff]   ;;  %s3285_s22 = scalar_lea.vmem %s4138_s0, %s2979_s12  ;;  %s3917_s15 = scalar_lea.vmem %s4145_s7, %s2979_s12 }
  0x12   : > { %2695 = vmatprep.subr.bf16.mxu0 %v2997_v8  ;;  %v3004_v15 = vld [vmem:[%s4139_s1 + $0xa0] sm:$0xff]   ;;  %v3008_v19 = vld [vmem:[%s4139_s1 + $0x98] sm:$0xff]   ;;  %v3012_v23 = vld [vmem:[%s4139_s1 + $0x90] sm:$0xff]  }
  0x13   : > { %2758 = vmatpush3.bf16.msra.mxu1 %v2996_v7  ;;  %v3013_v24 = vld [vmem:[%s4139_s1 + $0x48] sm:$0xff]   ;;  %v3017_v28 = vld [vmem:[%s4139_s1 + $0x40] sm:$0xff]   ;;  %v295_v32 = vld [vmem:[%s3285_s22 + $0x38] sm:$0xff] }
  0x14   : > { %2759 = vmatprep.subr.bf16.mxu1 %v2999_v10  ;;  %v3014_v25 = vld [vmem:[%s4139_s1 + $0x8] sm:$0xff]   ;;  %v3018_v29 = vld [vmem:[%s4139_s1] sm:$0xff]   ;;  %v294_v37 = vld [vmem:[%s3285_s22 + $0x30] sm:$0xff] }
  0x15   : > { %2696 = vmatpush3.bf16.msra.mxu0 %v2998_v9  ;;  %v3015_v26 = vld [vmem:[%s4139_s1 + $0xc8] sm:$0xff]   ;;  %v3019_v30 = vld [vmem:[%s4139_s1 + $0xc0] sm:$0xff]   ;;  %v291_v38 = vld [vmem:[%s3285_s22 + $0x18] sm:$0xff] }
  0x16   : > { %2697 = vmatprep.subr.bf16.mxu0 %v3001_v12  ;;  %v3016_v27 = vld [vmem:[%s4139_s1 + $0x88] sm:$0xff]   ;;  %v3020_v34 = vld [vmem:[%s4139_s1 + $0x80] sm:$0xff]   ;;  %v3021_v42 = vld [vmem:[%s4139_s1 + $0x138] sm:$0xff]  }
  0x17   : > { %2760 = vmatpush3.bf16.msra.mxu1 %v3000_v11  ;;  %v289_v31 = vld [vmem:[%s3285_s22 + $0x8] sm:$0xff]  ;;  %v288_v35 = vld [vmem:[%s3285_s22] sm:$0xff]  ;;  %v290_v43 = vld [vmem:[%s3285_s22 + $0x10] sm:$0xff] }
  0x18   : > { %2761 = vmatprep.subr.bf16.mxu1 %v3003_v14  ;;  %v385_v33 = vpack.c.bf16 %v295_v32, %v289_v31  ;;  %v297_v39 = vld [vmem:[%s3285_s22 + $0x48] sm:$0xff]  ;;  %v384_v40 = vpack.c.bf16 %v294_v37, %v288_v35  ;;  %v296_v44 = vld [vmem:[%s3285_s22 + $0x40] sm:$0xff]  ;;  %v3022_v46 = vld [vmem:[%s4139_s1 + $0x130] sm:$0xff]  }
  0x19   : > { %2698 = vmatpush3.bf16.msra.mxu0 %v3002_v13  ;;  %v387_v41 = vpack.c.bf16 %v297_v39, %v291_v38  ;;  %v386_v45 = vpack.c.bf16 %v296_v44, %v290_v43  ;;  %v301_v47 = vld [vmem:[%s3285_s22 + $0x68] sm:$0xff]  ;;  %v307_v48 = vld [vmem:[%s3285_s22 + $0x98] sm:$0xff]  ;;  %v300_v49 = vld [vmem:[%s3285_s22 + $0x60] sm:$0xff] }
  0x1a   : > { %2699 = vmatprep.subr.bf16.mxu0 %v3005_v16  ;;  %866 = vmatprep.mubr.bf16.mxu0 %v385_v33  ;;  %v306_v50 = vld [vmem:[%s3285_s22 + $0x90] sm:$0xff]  ;;  %v391_v51 = vpack.c.bf16 %v307_v48, %v301_v47  ;;  %v303_v52 = vld [vmem:[%s3285_s22 + $0x78] sm:$0xff]  ;;  %v309_v53 = vld [vmem:[%s3285_s22 + $0xa8] sm:$0xff] }
  0x1b   : > { %2762 = vmatpush3.bf16.msra.mxu1 %v3004_v15  ;;  %963 = vmatprep.mubr.bf16.mxu1 %v387_v41  ;;  %v302_v54 = vld [vmem:[%s3285_s22 + $0x70] sm:$0xff]  ;;  %v393_v55 = vpack.c.bf16 %v309_v53, %v303_v52  ;;  %v308_v56 = vld [vmem:[%s3285_s22 + $0xa0] sm:$0xff]  ;;  %v390_v57 = vpack.c.bf16 %v306_v50, %v300_v49  ;;  %v313_v58 = vld [vmem:[%s3285_s22 + $0xc8] sm:$0xff] }
  0x1c   : > { %2763 = vmatprep.subr.bf16.mxu1 %v3007_v18  ;;  %v319_v59 = vld [vmem:[%s3285_s22 + $0xf8] sm:$0xff]  ;;  %v3023_v60 = vld [vmem:[%s4139_s1 + $0x128] sm:$0xff]   ;;  %v392_v62 = vpack.c.bf16 %v308_v56, %v302_v54  ;;  %v3024_v1 = vld [vmem:[%s4139_s1 + $0x120] sm:$0xff]  }
  0x1d   : > { %2700 = vmatpush3.bf16.msra.mxu0 %v3006_v17  ;;  %v397_v61 = vpack.c.bf16 %v319_v59, %v313_v58  ;;  %v315_v63 = vld [vmem:[%s3285_s22 + $0xd8] sm:$0xff]  ;;  %v321_v0 = vld [vmem:[%s3285_s22 + $0x108] sm:$0xff]  ;;  %v312_v3 = vld [vmem:[%s3285_s22 + $0xc0] sm:$0xff] }
  0x1e   : > { %2701 = vmatprep.subr.bf16.mxu0 %v3009_v20  ;;  %v399_v2 = vpack.c.bf16 %v321_v0, %v315_v63  ;;  %v318_v4 = vld [vmem:[%s3285_s22 + $0xf0] sm:$0xff]  ;;  %v325_v5 = vld [vmem:[%s3285_s22 + $0x128] sm:$0xff]  ;;  %v331_v6 = vld [vmem:[%s3285_s22 + $0x158] sm:$0xff] }
  0x1f   : > { %2764 = vmatpush3.bf16.msra.mxu1 %v3008_v19  ;;  %v314_v7 = vld [vmem:[%s3285_s22 + $0xd0] sm:$0xff]  ;;  %v320_v8 = vld [vmem:[%s3285_s22 + $0x100] sm:$0xff]  ;;  %v396_v9 = vpack.c.bf16 %v318_v4, %v312_v3  ;;  %v327_v10 = vld [vmem:[%s3285_s22 + $0x138] sm:$0xff]  ;;  %v403_v13 = vpack.c.bf16 %v331_v6, %v325_v5 }
  0x20   : > { %2765 = vmatprep.subr.bf16.mxu1 %v3011_v22  ;;  %v333_v11 = vld [vmem:[%s3285_s22 + $0x168] sm:$0xff]  ;;  %v3025_v12 = vld [vmem:[%s4139_s1 + $0x118] sm:$0xff]   ;;  %v398_v14 = vpack.c.bf16 %v320_v8, %v314_v7  ;;  %v324_v16 = vld [vmem:[%s3285_s22 + $0x120] sm:$0xff] }
  0x21   : > { %2702 = vmatpush3.bf16.msra.mxu0 %v3010_v21  ;;  %v405_v15 = vpack.c.bf16 %v333_v11, %v327_v10  ;;  %v330_v17 = vld [vmem:[%s3285_s22 + $0x150] sm:$0xff]  ;;  %v337_v19 = vld [vmem:[%s3285_s22 + $0x188] sm:$0xff]  ;;  %v343_v20 = vld [vmem:[%s3285_s22 + $0x1b8] sm:$0xff] }
  0x22   : > { %2703 = vmatprep.subr.bf16.mxu0 %v3013_v24  ;;  %v3026_v18 = vld [vmem:[%s4139_s1 + $0x110] sm:$0xff]   ;;  %v332_v22 = vld [vmem:[%s3285_s22 + $0x160] sm:$0xff]  ;;  %v339_v24 = vld [vmem:[%s3285_s22 + $0x198] sm:$0xff] }
  0x23   : > { %2766 = vmatpush3.bf16.msra.mxu1 %v3012_v23  ;;  %v326_v21 = vld [vmem:[%s3285_s22 + $0x130] sm:$0xff]  ;;  %v402_v23 = vpack.c.bf16 %v330_v17, %v324_v16  ;;  %v3029_v32 = vld [vmem:[%s4139_s1 + $0x168] ss:$0 sps:$4 sm:$0x11]   ;;  %v3028_v33 = vld [vmem:[%s4139_s1 + $0x100] sm:$0xff]  }
  0x24   : > { %2767 = vmatprep.subr.bf16.mxu1 %v3015_v26  ;;  %v3027_v26 = vld [vmem:[%s4139_s1 + $0x108] sm:$0xff]   ;;  %v342_v31 = vld [vmem:[%s3285_s22 + $0x1b0] sm:$0xff]  ;;  %v355_v37 = vld [vmem:[%s3285_s22 + $0x218] sm:$0xff] }
  0x25   : > { %2704 = vmatpush3.bf16.msra.mxu0 %v3014_v25  ;;  %v345_v25 = vld [vmem:[%s3285_s22 + $0x1c8] sm:$0xff]  ;;  %v338_v38 = vld [vmem:[%s3285_s22 + $0x190] sm:$0xff]  ;;  %v344_v39 = vld [vmem:[%s3285_s22 + $0x1c0] sm:$0xff] }
  0x26   : > { %2705 = vmatprep.subr.bf16.mxu0 %v3017_v28  ;;  %v404_v28 = vpack.c.bf16 %v332_v22, %v326_v21  ;;  %v349_v35 = vld [vmem:[%s3285_s22 + $0x1e8] sm:$0xff]  ;;  %v351_v41 = vld [vmem:[%s3285_s22 + $0x1f8] sm:$0xff]  ;;  %v348_v47 = vld [vmem:[%s3285_s22 + $0x1e0] sm:$0xff] }
  0x27   : > { %2768 = vmatpush3.bf16.msra.mxu1 %v3016_v27  ;;  %v409_v27 = vpack.c.bf16 %v343_v20, %v337_v19  ;;  %v415_v44 = vpack.c.bf16 %v355_v37, %v349_v35  ;;  %v354_v48 = vld [vmem:[%s3285_s22 + $0x210] sm:$0xff]  ;;  %v3030_v49 = vld [vmem:[%s4139_s1 + $0x160] sm:$0xff]   ;;  %v361_v50 = vld [vmem:[%s3285_s22 + $0x248] sm:$0xff] }
  0x28   : > { %2769 = vmatprep.subr.bf16.mxu1 %v3019_v30  ;;  %v336_v30 = vld [vmem:[%s3285_s22 + $0x180] sm:$0xff]  ;;  %v350_v52 = vld [vmem:[%s3285_s22 + $0x1f0] sm:$0xff]  ;;  %v414_v54 = vpack.c.bf16 %v354_v48, %v348_v47  ;;  %v369_v56 = vld [vmem:[%s3285_s22 + $0x288] sm:$0xff] }
  0x29   : > { %2706 = vmatpush3.bf16.msra.mxu0 %v3018_v29  ;;  %v411_v29 = vpack.c.bf16 %v345_v25, %v339_v24  ;;  %v356_v53 = vld [vmem:[%s3285_s22 + $0x220] sm:$0xff]  ;;  %v3031_v58 = vld [vmem:[%s4139_s1 + $0x158] sm:$0xff]   ;;  %v3032_v63 = vld [vmem:[%s4139_s1 + $0x150] sm:$0xff]  }
  0x2a   : > { %1028 = vmatprep.subr.bf16.mxu0 %v4146_v36  ;;  %v416_v59 = vpack.c.bf16 %v356_v53, %v350_v52  ;;  %v362_v0 = vld [vmem:[%s3285_s22 + $0x250] sm:$0xff]  ;;  %v379_v3 = vld [vmem:[%s3285_s22 + $0x2d8] sm:$0xff]  ;;  %v381_v5 = vld [vmem:[%s3285_s22 + $0x2e8] sm:$0xff] }
  0x2b   : > { %2770 = vmatpush3.bf16.msra.mxu1 %v3020_v34  ;;  %v830_v34 = vsel %vm828_vm0, 65535, %v4146_v36  ;;  %v375_v4 = vld [vmem:[%s3285_s22 + $0x2b8] sm:$0xff]  ;;  %v3033_v6 = vld [vmem:[%s4139_s1 + $0x148] sm:$0xff]   ;;  %v372_v10 = vld [vmem:[%s3285_s22 + $0x2a0] sm:$0xff] }
  0x2c   : > { %867 = vmatmul.mubr.bf16.vlgmr.msra.gmra.mxu0 %v384_v40  ;;  %v408_v40 = vpack.c.bf16 %v342_v31, %v336_v30  ;;  %v832_v43 = vand.u32 %v3029_v32, %v830_v34  ;;  %v378_v11 = vld [vmem:[%s3285_s22 + $0x2d0] sm:$0xff]  ;;  %v380_v17 = vld [vmem:[%s3285_s22 + $0x2e0] sm:$0xff]  ;;  %v311_v24 = vld [vmem:[%s3285_s22 + $0xb8] sm:$0xff] }
  0x2d   : > { %1029 = vmatpush1.bf16.msra.mxu0 %v3021_v42  ;;  %874 = vmatprep.mubr.bf16.mxu0 %v391_v51  ;;  %v357_v42 = vld [vmem:[%s3285_s22 + $0x228] sm:$0xff]  ;;  %v367_v51 = vld [vmem:[%s3285_s22 + $0x278] sm:$0xff]  ;;  %v374_v16 = vld [vmem:[%s3285_s22 + $0x2b0] sm:$0xff] }
  0x2e   : > { %964 = vmatmul.mubr.bf16.vlgmr.msra.gmra.mxu1 %v386_v45  ;;  %1030 = vmatprep.subr.bf16.mxu0 %v4146_v36  ;;  %v410_v45 = vpack.c.bf16 %v344_v39, %v338_v38  ;;  %v428_v20 = vpack.c.bf16 %v380_v17, %v374_v16  ;;  %v292_v21 = vld [vmem:[%s3285_s22 + $0x20] sm:$0xff]  ;;  %v298_v22 = vld [vmem:[%s3285_s22 + $0x50] sm:$0xff]  ;;  %v323_v30 = vld [vmem:[%s3285_s22 + $0x118] sm:$0xff] }
  0x2f   : > { %971 = vmatprep.mubr.bf16.mxu1 %v393_v55  ;;  %v363_v55 = vld [vmem:[%s3285_s22 + $0x258] sm:$0xff]  ;;  %v388_v25 = vpack.c.bf16 %v298_v22, %v292_v21  ;;  %v322_v34 = vld [vmem:[%s3285_s22 + $0x110] sm:$0xff]  ;;  %v329_v35 = vld [vmem:[%s3285_s22 + $0x148] sm:$0xff] }
  0x30   : > { %v335_v37 = vld [vmem:[%s3285_s22 + $0x178] sm:$0xff]  ;;  %v340_v47 = vld [vmem:[%s3285_s22 + $0x1a0] sm:$0xff]  ;;  %v346_v48 = vld [vmem:[%s3285_s22 + $0x1d0] sm:$0xff] }
  0x31   : > { %1031 = vmatpush1.bf16.msra.mxu0 %v3022_v46  ;;  %v417_v46 = vpack.c.bf16 %v357_v42, %v351_v41  ;;  %v407_v39 = vpack.c.bf16 %v335_v37, %v329_v35  ;;  %v334_v41 = vld [vmem:[%s3285_s22 + $0x170] sm:$0xff]  ;;  %v3035_v42 = vld [vmem:[%s4141_s3 + $0x38] sm:$0xff]   ;;  %v412_v52 = vpack.c.bf16 %v346_v48, %v340_v47 }
  0x32   : > { %1032 = vmatprep.subr.bf16.mxu0 %v4146_v36  ;;  %2867 = vmatprep.subr.bf16.mxu1 %v3035_v42 }
  0x33   : > { %2868 = vmatpush3.bf16.msra.mxu1 %v3035_v42 }
  0x34   : > { %875 = vmatmul.mubr.bf16.gmra.mxu0 %v390_v57  ;;  %v421_v57 = vpack.c.bf16 %v367_v51, %v361_v50  ;;  %v353_v50 = vld [vmem:[%s3285_s22 + $0x208] sm:$0xff]  ;;  %v359_v51 = vld [vmem:[%s3285_s22 + $0x238] sm:$0xff] }
  0x35   : > { %1033 = vmatpush1.bf16.msra.mxu0 %v3023_v60  ;;  %882 = vmatprep.mubr.bf16.mxu0 %v397_v61  ;;  %v423_v60 = vpack.c.bf16 %v369_v56, %v363_v55  ;;  %v360_v61 = vld [vmem:[%s3285_s22 + $0x240] sm:$0xff]  ;;  %v419_v53 = vpack.c.bf16 %v359_v51, %v353_v50  ;;  %v358_v55 = vld [vmem:[%s3285_s22 + $0x230] sm:$0xff]  ;;  %v3037_v56 = vld [vmem:[%s4141_s3 + $0x28] sm:$0xff]  }
  0x36   : > { %972 = vmatmul.mubr.bf16.gmra.mxu1 %v392_v62  ;;  %1034 = vmatprep.subr.bf16.mxu0 %v4146_v36  ;;  %v366_v62 = vld [vmem:[%s3285_s22 + $0x270] sm:$0xff] }
  0x37   : > { %979 = vmatprep.mubr.bf16.mxu1 %v399_v2  ;;  %v373_v2 = vld [vmem:[%s3285_s22 + $0x2a8] sm:$0xff]  ;;  %v420_v7 = vpack.c.bf16 %v366_v62, %v360_v61  ;;  %v364_v61 = vld [vmem:[%s3285_s22 + $0x260] sm:$0xff]  ;;  %v370_v62 = vld [vmem:[%s3285_s22 + $0x290] sm:$0xff] }
  0x38   : > { %v427_v8 = vpack.c.bf16 %v379_v3, %v373_v2  ;;  %v424_v2 = vpack.c.bf16 %v370_v62, %v364_v61  ;;  %v3542_v62 = vld [vmem:[%s4140_s2] ss:$0 sm:$0xff] }
  0x39   : > { %1035 = vmatpush1.bf16.msra.mxu0 %v3024_v1  ;;  %v368_v1 = vld [vmem:[%s3285_s22 + $0x280] sm:$0xff] }
  0x3a   : > { %1036 = vmatprep.subr.bf16.mxu0 %v4146_v36 }
  0x3c   : > { %883 = vmatmul.mubr.bf16.gmra.mxu0 %v396_v9  ;;  %v422_v9 = vpack.c.bf16 %v368_v1, %v362_v0  ;;  %v377_v0 = vld [vmem:[%s3285_s22 + $0x2c8] sm:$0xff]  ;;  %v383_v1 = vld [vmem:[%s3285_s22 + $0x2f8] sm:$0xff] }
  0x3d   : > { %1037 = vmatpush1.bf16.msra.mxu0 %v3025_v12  ;;  %890 = vmatprep.mubr.bf16.mxu0 %v403_v13  ;;  %v429_v12 = vpack.c.bf16 %v381_v5, %v375_v4  ;;  %v3034_v13 = vld [vmem:[%s4139_s1 + $0x140] sm:$0xff]   ;;  %v431_v3 = vpack.c.bf16 %v383_v1, %v377_v0  ;;  %v382_v5 = vld [vmem:[%s3285_s22 + $0x2f0] sm:$0xff] }
  0x3e   : > { %980 = vmatmul.mubr.bf16.gmra.mxu1 %v398_v14  ;;  %1038 = vmatprep.subr.bf16.mxu0 %v4146_v36  ;;  %v293_v14 = vld [vmem:[%s3285_s22 + $0x28] sm:$0xff]  ;;  %v376_v4 = vld [vmem:[%s3285_s22 + $0x2c0] sm:$0xff] }
  0x3f   : > { %987 = vmatprep.mubr.bf16.mxu1 %v405_v15  ;;  %v299_v15 = vld [vmem:[%s3285_s22 + $0x58] sm:$0xff] }
  0x40   : > { %v389_v19 = vpack.c.bf16 %v299_v15, %v293_v14 }
  0x41   : > { %1039 = vmatpush1.bf16.msra.mxu0 %v3026_v18  ;;  %v426_v18 = vpack.c.bf16 %v378_v11, %v372_v10  ;;  %v3042_v10 = vld [vmem:[%s4141_s3] sm:$0xff]  }
  0x42   : > { %1040 = vmatprep.subr.bf16.mxu0 %v4146_v36 }
  0x44   : > { %891 = vmatmul.mubr.bf16.gmra.mxu0 %v402_v23  ;;  %v305_v23 = vld [vmem:[%s3285_s22 + $0x88] sm:$0xff] }
  0x45   : > { %1041 = vmatpush1.bf16.msra.mxu0 %v3027_v26  ;;  %898 = vmatprep.mubr.bf16.mxu0 %v409_v27  ;;  %v395_v26 = vpack.c.bf16 %v311_v24, %v305_v23  ;;  %v304_v27 = vld [vmem:[%s3285_s22 + $0x80] sm:$0xff] }
  0x46   : > { %988 = vmatmul.mubr.bf16.gmra.mxu1 %v404_v28  ;;  %1042 = vmatprep.subr.bf16.mxu0 %v4146_v36  ;;  %v310_v28 = vld [vmem:[%s3285_s22 + $0xb0] sm:$0xff] }
  0x47   : > { %995 = vmatprep.mubr.bf16.mxu1 %v411_v29  ;;  %v317_v29 = vld [vmem:[%s3285_s22 + $0xe8] sm:$0xff]  ;;  %v394_v31 = vpack.c.bf16 %v310_v28, %v304_v27 }
  0x48   : > { %v401_v32 = vpack.c.bf16 %v323_v30, %v317_v29 }
  0x49   : > { %1043 = vmatpush1.bf16.msra.mxu0 %v3028_v33  ;;  %v316_v33 = vld [vmem:[%s3285_s22 + $0xe0] sm:$0xff] }
  0x4a   : > { %1048 = vmatprep.subr.bf16.mxu0 %v4146_v36  ;;  %v400_v38 = vpack.c.bf16 %v322_v34, %v316_v33 }
  0x4c   : > { %899 = vmatmul.mubr.bf16.gmra.mxu0 %v408_v40  ;;  %v328_v40 = vld [vmem:[%s3285_s22 + $0x140] sm:$0xff] }
  0x4d   : > { %1049 = vmatpush2.bf16.msra.mxu0 %v832_v43  ;;  %906 = vmatprep.mubr.bf16.mxu0 %v415_v44  ;;  %v341_v43 = vld [vmem:[%s3285_s22 + $0x1a8] sm:$0xff]  ;;  %v347_v44 = vld [vmem:[%s3285_s22 + $0x1d8] sm:$0xff] }
  0x4e   : > { %996 = vmatmul.mubr.bf16.gmra.mxu1 %v410_v45  ;;  %1050 = vmatprep.subr.bf16.mxu0 %v4146_v36  ;;  %v406_v45 = vpack.c.bf16 %v334_v41, %v328_v40 }
  0x4f   : > { %1003 = vmatprep.mubr.bf16.mxu1 %v417_v46  ;;  %v413_v46 = vpack.c.bf16 %v347_v44, %v341_v43 }
  0x51   : > { %1051 = vmatpush2.bf16.msra.mxu0 %v3030_v49  ;;  %v3036_v49 = vld [vmem:[%s4141_s3 + $0x30] sm:$0xff]  }
  0x52   : > { %1052 = vmatprep.subr.bf16.mxu0 %v4146_v36  ;;  %2869 = vmatprep.subr.bf16.mxu1 %v3036_v49 }
  0x53   : > { %2870 = vmatpush3.bf16.msra.mxu1 %v3036_v49 }
  0x54   : > { %907 = vmatmul.mubr.bf16.gmra.mxu0 %v414_v54  ;;  %v352_v54 = vld [vmem:[%s3285_s22 + $0x200] sm:$0xff]  ;;  %2871 = vmatprep.subr.bf16.mxu1 %v3037_v56 }
  0x55   : > { %914 = vmatprep.mubr.bf16.mxu0 %v421_v57  ;;  %1053 = vmatpush2.bf16.msra.mxu0 %v3031_v58  ;;  %v365_v57 = vld [vmem:[%s3285_s22 + $0x268] sm:$0xff]  ;;  %v371_v58 = vld [vmem:[%s3285_s22 + $0x298] sm:$0xff] }
  0x56   : > { %1004 = vmatmul.mubr.bf16.gmra.mxu1 %v416_v59  ;;  %1054 = vmatprep.subr.bf16.mxu0 %v4146_v36  ;;  %v418_v59 = vpack.c.bf16 %v358_v55, %v352_v54 }
  0x57   : > { %1011 = vmatprep.mubr.bf16.mxu1 %v423_v60  ;;  %2872 = vmatpush3.bf16.msra.mxu1 %v3037_v56  ;;  %v425_v60 = vpack.c.bf16 %v371_v58, %v365_v57 }
  0x59   : > { %1055 = vmatpush2.bf16.msra.mxu0 %v3032_v63  ;;  %v3038_v63 = vld [vmem:[%s4141_s3 + $0x20] sm:$0xff]  }
  0x5a   : > { %1056 = vmatprep.subr.bf16.mxu0 %v4146_v36  ;;  %2873 = vmatprep.subr.bf16.mxu1 %v3038_v63 }
  0x5b   : > { %2874 = vmatpush3.bf16.msra.mxu1 %v3038_v63 }
  0x5c   : > { %915 = vmatmul.mubr.bf16.gmra.mxu0 %v420_v7  ;;  %v430_v7 = vpack.c.bf16 %v382_v5, %v376_v4 }
  0x5d   : > { %922 = vmatprep.mubr.bf16.mxu0 %v427_v8  ;;  %1057 = vmatpush2.bf16.msra.mxu0 %v3033_v6  ;;  %v3039_v6 = vld [vmem:[%s4141_s3 + $0x18] sm:$0xff]   ;;  %v3040_v8 = vld [vmem:[%s4141_s3 + $0x10] sm:$0xff]  }
  0x5e   : > { %1012 = vmatmul.mubr.bf16.gmra.mxu1 %v422_v9  ;;  %1058 = vmatprep.subr.bf16.mxu0 %v4146_v36  ;;  %v3041_v9 = vld [vmem:[%s4141_s3 + $0x8] sm:$0xff]  }
  0x5f   : > { %1019 = vmatprep.mubr.bf16.mxu1 %v429_v12  ;;  %2875 = vmatprep.subr.bf16.mxu1 %v3039_v6  ;;  %v3484_v12 = vld [vmem:[%s4141_s3 + $0x78] sm:$0xff]  }
  0x60   : > { %2876 = vmatpush3.bf16.msra.mxu1 %v3039_v6 }
  0x61   : > { %1059 = vmatpush2.bf16.msra.mxu0 %v3034_v13  ;;  %2877 = vmatprep.subr.bf16.mxu1 %v3040_v8 }
  0x64   : > { %923 = vmatmul.mubr.bf16.gmra.mxu0 %v426_v18  ;;  %2878 = vmatpush3.bf16.msra.mxu1 %v3040_v8 }
  0x65   : > { %2574 = vmatprep.mubr.msk.bf16.mxu0 %vm803_vm1, %v389_v19  ;;  %2879 = vmatprep.subr.bf16.mxu1 %v3041_v9 }
  0x66   : > { %1020 = vmatmul.mubr.bf16.gmra.mxu1 %v428_v20 }
  0x68   : > { %2880 = vmatpush3.bf16.msra.mxu1 %v3041_v9 }
  0x69   : > { %2881 = vmatprep.subr.bf16.mxu1 %v3042_v10 }
  0x6c   : > { %1061 = vmatmul.mubr.bf16.vlgmr.msra.gmra.mxu0 %v388_v25  ;;  %2882 = vmatpush3.bf16.msra.mxu1 %v3042_v10 }
  0x6d   : > { %2575 = vmatprep.mubr.msk.bf16.mxu0 %vm803_vm1, %v395_v26  ;;  %2899 = vmatprep.subr.bf16.mxu1 %v3484_v12 }
  0x74   : > { %1069 = vmatmul.mubr.bf16.gmra.mxu0 %v394_v31 }
  0x75   : > { %2576 = vmatprep.mubr.msk.bf16.mxu0 %vm803_vm1, %v401_v32 }
  0x7c   : > { %1077 = vmatmul.mubr.bf16.gmra.mxu0 %v400_v38 }
  0x7d   : > { %2577 = vmatprep.mubr.msk.bf16.mxu0 %vm803_vm1, %v407_v39 }
  0x84   : > { %1085 = vmatmul.mubr.bf16.gmra.mxu0 %v406_v45 }
  0x85   : > { %2578 = vmatprep.mubr.msk.bf16.mxu0 %vm803_vm1, %v413_v46 }
  0x8c   : > { %1093 = vmatmul.mubr.bf16.gmra.mxu0 %v412_v52 }
  0x8d   : > { %2579 = vmatprep.mubr.msk.bf16.mxu0 %vm803_vm1, %v419_v53 }
  0x94   : > { %1101 = vmatmul.mubr.bf16.gmra.mxu0 %v418_v59 }
  0x95   : > { %2580 = vmatprep.mubr.msk.bf16.mxu0 %vm803_vm1, %v425_v60 }
  0x9c   : > { %1109 = vmatmul.mubr.bf16.gmra.mxu0 %v424_v2 }
  0x9d   : > { %2581 = vmatprep.mubr.msk.bf16.mxu0 %vm803_vm1, %v431_v3 }
  0xa4   : > { %1117 = vmatmul.mubr.bf16.gmra.mxu0 %v430_v7 }
  0xec   : > { %v2707_v11 = vpop.f32.mrf.mxu0 }
  0xee   : > { %v2708_v13 = vpop.f32.mrf.mxu0  ;;  %v2771_v14 = vpop.f32.mrf.mxu1 }
  0xef   : > { %v2709_v60 = vadd.f32 %v2708_v13, %v2707_v11 }
  0xf0   : > { %v2710_v15 = vpop.f32.mrf.mxu0  ;;  %v2772_v16 = vpop.f32.mrf.mxu1 }
  0xf1   : > { %v869_v2 = vadd.f32 %v2709_v60, %v3542_v62  ;;  %v2773_v3 = vadd.f32 %v2772_v16, %v2771_v14 }
  0xf2   : > { %v2711_v17 = vpop.f32.mrf.mxu0  ;;  %v2774_v18 = vpop.f32.mrf.mxu1 }
  0xf3   : > { %v2712_v61 = vadd.f32 %v2711_v17, %v2710_v15  ;;  %v966_v11 = vadd.f32 %v2773_v3, %v869_v2 }
  0xf4   : > { %v2713_v19 = vpop.f32.mrf.mxu0  ;;  %v2775_v20 = vpop.f32.mrf.mxu1 }
  0xf5   : > { %v872_v4 = vadd.f32 %v2712_v61, %v3542_v62  ;;  %v2776_v5 = vadd.f32 %v2775_v20, %v2774_v18 }
  0xf6   : > { %v2714_v21 = vpop.f32.mrf.mxu0  ;;  %v2777_v22 = vpop.f32.mrf.mxu1 }
  0xf7   : > { %v2715_v8 = vadd.f32 %v2714_v21, %v2713_v19  ;;  %v969_v13 = vadd.f32 %v2776_v5, %v872_v4 }
  0xf8   : > { %v2716_v23 = vpop.f32.mrf.mxu0  ;;  %v2778_v24 = vpop.f32.mrf.mxu1 }
  0xf9   : > { %v2779_v14 = vadd.f32 %v2778_v24, %v2777_v22 }
  0xfa   : > { %v2717_v25 = vpop.f32.mrf.mxu0  ;;  %v2780_v26 = vpop.f32.mrf.mxu1 }
  0xfb   : > { %v2718_v10 = vadd.f32 %v2717_v25, %v2716_v23 }
  0xfc   : > { %v2719_v27 = vpop.f32.mrf.mxu0  ;;  %v2781_v29 = vpop.f32.mrf.mxu1 }
  0xfd   : > { %v880_v16 = vadd.f32 %v2718_v10, %v3542_v62  ;;  %v2782_v18 = vadd.f32 %v2781_v29, %v2780_v26 }
  0xfe   : > { %v2720_v28 = vpop.f32.mrf.mxu0  ;;  %v3487_v32 = vpop.f32.mrf.mxu1 }
  0xff   : > { %v2721_v21 = vadd.f32 %v2720_v28, %v2719_v27  ;;  %v977_v3 = vadd.f32 %v2782_v18, %v880_v16  ;;  %v3044_v28 = vld [vmem:[%s4141_s3 + $0x70] sm:$0xff]  }
 0x100   : > { %v2722_v30 = vpop.f32.mrf.mxu0  ;;  %v3493_v35 = vpop.f32.mrf.mxu1 }
 0x101   : > { %v885_v22 = vadd.f32 %v2721_v21, %v3542_v62 }
 0x102   : > { %v2723_v31 = vpop.f32.mrf.mxu0  ;;  %v3499_v39 = vpop.f32.mrf.mxu1 }
 0x103   : > { %v2724_v25 = vadd.f32 %v2723_v31, %v2722_v30 }
 0x104   : > { %v3489_v33 = vpop.f32.mrf.mxu0  ;;  %v2787_v42 = vpop.f32.mrf.mxu1 }
 0x105   : > { %v888_v26 = vadd.f32 %v2724_v25, %v3542_v62  ;;  %v2788_v29 = vadd.f32 %v2787_v42, %v3499_v39  ;;  %v3045_v42 = vld [vmem:[%s4141_s3 + $0x68] sm:$0xff]  }
 0x106   : > { %v3491_v34 = vpop.f32.mrf.mxu0  ;;  %v3509_v45 = vpop.f32.mrf.mxu1 }
 0x107   : > { %v985_v39 = vadd.f32 %v2788_v29, %v888_v26 }
 0x108   : > { %v3495_v37 = vpop.f32.mrf.mxu0  ;;  %v3515_v48 = vpop.f32.mrf.mxu1 }
 0x10a   : > { %v3497_v38 = vpop.f32.mrf.mxu0  ;;  %v3521_v51 = vpop.f32.mrf.mxu1 }
 0x10c   : > { %v3501_v40 = vpop.f32.mrf.mxu0  ;;  %v3527_v54 = vpop.f32.mrf.mxu1 }
 0x10e   : > { %v3503_v41 = vpop.f32.mrf.mxu0  ;;  %v3533_v57 = vpop.f32.mrf.mxu1 }
 0x10f   : > { %v2733_v18 = vadd.f32 %v3503_v41, %v3501_v40 }
 0x110   : > { %v3505_v43 = vpop.f32.mrf.mxu0  ;;  %v3544_v63 = vpop.f32.mrf.mxu1 }
 0x111   : > { %v2797_v40 = vadd.f32 %v3544_v63, %v3533_v57 }
 0x112   : > { %v3507_v44 = vpop.f32.mrf.mxu0  ;;  %v3552_v6 = vpop.f32.mrf.mxu1 }
 0x114   : > { %v3511_v46 = vpop.f32.mrf.mxu0  ;;  %v3554_v15 = vpop.f32.mrf.mxu1 }
 0x116   : > { %v3513_v47 = vpop.f32.mrf.mxu0  ;;  %v3558_v61 = vpop.f32.mrf.mxu1 }
 0x118   : > { %v3517_v49 = vpop.f32.mrf.mxu0  ;;  %v3560_v4 = vpop.f32.mrf.mxu1 }
 0x11a   : > { %v3519_v50 = vpop.f32.mrf.mxu0  ;;  %v3570_v30 = vpop.f32.mrf.mxu1 }
 0x11c   : > { %v3523_v52 = vpop.f32.mrf.mxu0 }
 0x11e   : > { %v3525_v53 = vpop.f32.mrf.mxu0 }
 0x120   : > { %v3529_v55 = vpop.f32.mrf.mxu0 }
 0x122   : > { %v3531_v56 = vpop.f32.mrf.mxu0 }
 0x124   : > { %v3535_v58 = vpop.f32.mrf.mxu0 }
 0x126   : > { %v3537_v59 = vpop.f32.mrf.mxu0 }
 0x128   : > { %v3546_v0 = vpop.f32.mrf.mxu0 }
 0x129   : > { %4148 = vst [vmem:[#allocation2_spill] sm:$0xff] %v3546_v0 }
 0x12a   : > { %v3548_v1 = vpop.f32.mrf.mxu0 }
 0x12b   : > { %4149 = vst [vmem:[#allocation3_spill] sm:$0xff] %v3548_v1  ;;  %v877_v1 = vadd.f32 %v2715_v8, %v3542_v62 }
 0x12c   : > { %v1062_v7 = vpop.f32.mrf.mxu0 }
 0x12d   : > { %v1063_v36 = vadd.f32 %v1062_v7, %v966_v11  ;;  %v974_v2 = vadd.f32 %v2779_v14, %v877_v1 }
 0x12e   : > { %v1064_v9 = vpop.f32.mrf.mxu0 }
 0x12f   : > { %v2805_v9 = vpop.f32.mrf.mxu1 }
 0x130   : > { %v1065_v17 = vpop.f32.mrf.mxu0 }
 0x131   : > { %v1066_v0 = vadd.f32 %v1065_v17, %v969_v13  ;;  %v2807_v14 = vpop.f32.mrf.mxu1 }
 0x132   : > { %v1067_v60 = vpop.f32.mrf.mxu0 }
 0x133   : > { %v1125_v20 = vpack.c.bf16 %v1066_v0, %v1063_v36  ;;  %v2785_v36 = vadd.f32 %v3493_v35, %v3487_v32  ;;  %v2727_v0 = vadd.f32 %v3491_v34, %v3489_v33  ;;  %v2730_v32 = vadd.f32 %v3497_v38, %v3495_v37  ;;  %v3046_v60 = vld [vmem:[%s4141_s3 + $0x60] sm:$0xff]  }
 0x134   : > { %v1070_v19 = vpop.f32.mrf.mxu0  ;;  %v2794_v37 = vadd.f32 %v3527_v54, %v3521_v51  ;;  %v3047_v51 = vld [vmem:[%s4141_s3 + $0x58] sm:$0xff]   ;;  %v2808_v54 = vpop.f32.mrf.mxu1 }
 0x135   : > { %2883 = vmatprep.mubr.bf16.mxu1 %v1125_v20  ;;  %v1071_v7 = vadd.f32 %v1070_v19, %v974_v2  ;;  %v982_v35 = vadd.f32 %v2785_v36, %v885_v22  ;;  %v893_v17 = vadd.f32 %v2727_v0, %v3542_v62  ;;  %v896_v34 = vadd.f32 %v2730_v32, %v3542_v62 }
 0x136   : > { %v1072_v23 = vpop.f32.mrf.mxu0  ;;  %v901_v2 = vadd.f32 %v2733_v18, %v3542_v62  ;;  %v2748_v32 = vadd.f32 %v3531_v56, %v3529_v55  ;;  %v4150_v56 = vld [vmem:[#allocation2_spill] sm:$0xff] }
 0x137   : > { %v993_v19 = vadd.f32 %v2794_v37, %v896_v34  ;;  %v4151_v34 = vld [vmem:[#allocation3_spill] sm:$0xff] }
 0x138   : > { %v1073_v5 = vpop.f32.mrf.mxu0  ;;  %v998_v36 = vadd.f32 %v2797_v40, %v901_v2  ;;  %v2754_v37 = vadd.f32 %v4151_v34, %v4150_v56 }
 0x139   : > { %v1074_v8 = vadd.f32 %v1073_v5, %v977_v3  ;;  %v2810_v5 = vpop.f32.mrf.mxu1 }
 0x13a   : > { %v1075_v24 = vpop.f32.mrf.mxu0 }
 0x13b   : > { %v1126_v27 = vpack.c.bf16 %v1074_v8, %v1071_v7  ;;  %v2739_v8 = vadd.f32 %v3513_v47, %v3511_v46  ;;  %v2742_v24 = vadd.f32 %v3519_v50, %v3517_v49  ;;  %v2811_v63 = vpop.f32.mrf.mxu1  ;;  %v2806_v46 = vadd.f32 %v2805_v9, %v3570_v30 }
 0x13c   : > { %v1078_v31 = vpop.f32.mrf.mxu0  ;;  %v2745_v49 = vadd.f32 %v3525_v53, %v3523_v52  ;;  %v2809_v9 = vadd.f32 %v2808_v54, %v2807_v14  ;;  %v2751_v53 = vadd.f32 %v3537_v59, %v3535_v58 }
 0x13d   : > { %2884 = vmatmul.mubr.bf16.vlgmr.msra.gmra.mxu1 %v1126_v27  ;;  %v1079_v11 = vadd.f32 %v1078_v31, %v982_v35  ;;  %v912_v31 = vadd.f32 %v2742_v24, %v3542_v62  ;;  %v2813_v0 = vpop.f32.mrf.mxu1  ;;  %v3054_v24 = vld [vmem:[%s4141_s3 + $0xa0] sm:$0xff]  }
 0x13e   : > { %v1080_v1 = vpop.f32.mrf.mxu0  ;;  %2900 = vmatpush3.bf16.msra.mxu1 %v3484_v12  ;;  %v2791_v12 = vadd.f32 %v3515_v48, %v3509_v45  ;;  %v2736_v45 = vadd.f32 %v3507_v44, %v3505_v43  ;;  %v2800_v43 = vadd.f32 %v3554_v15, %v3552_v6  ;;  %v909_v6 = vadd.f32 %v2739_v8, %v3542_v62  ;;  %v3052_v8 = vld [vmem:[%s4141_s3 + $0xb0] sm:$0xff]  }
 0x13f   : > { %2901 = vmatprep.subr.bf16.mxu1 %v3044_v28 }
 0x140   : > { %v1081_v10 = vpop.f32.mrf.mxu0  ;;  %v990_v48 = vadd.f32 %v2791_v12, %v893_v17  ;;  %v904_v41 = vadd.f32 %v2736_v45, %v3542_v62  ;;  %v2812_v17 = vadd.f32 %v2811_v63, %v2810_v5  ;;  %v925_v45 = vadd.f32 %v2751_v53, %v3542_v62  ;;  %v3050_v5 = vld [vmem:[%s4141_s3 + $0x40] sm:$0xff]   ;;  %v3057_v63 = vld [vmem:[%s4141_s3 + $0x88] sm:$0xff]  }
 0x141   : > { %v1082_v13 = vadd.f32 %v1081_v10, %v985_v39  ;;  %v1009_v39 = vadd.f32 %v2806_v46, %v912_v31 }
 0x142   : > { %v1083_v33 = vpop.f32.mrf.mxu0  ;;  %2902 = vmatpush3.bf16.msra.mxu1 %v3044_v28  ;;  %v1001_v57 = vadd.f32 %v2800_v43, %v904_v41  ;;  %v2803_v28 = vadd.f32 %v3560_v4, %v3558_v61 }
 0x143   : > { %v1127_v38 = vpack.c.bf16 %v1082_v13, %v1079_v11  ;;  %2903 = vmatprep.subr.bf16.mxu1 %v3045_v42  ;;  %v917_v11 = vadd.f32 %v2745_v49, %v3542_v62  ;;  %v920_v13 = vadd.f32 %v2748_v32, %v3542_v62 }
 0x144   : > { %v1086_v16 = vpop.f32.mrf.mxu0  ;;  %v1006_v35 = vadd.f32 %v2803_v28, %v909_v6 }
 0x145   : > { %2887 = vmatprep.mubr.bf16.mxu1 %v1127_v38  ;;  %v1087_v23 = vadd.f32 %v1086_v16, %v990_v48  ;;  %v1014_v38 = vadd.f32 %v2809_v9, %v917_v11 }
 0x146   : > { %v1088_v20 = vpop.f32.mrf.mxu0  ;;  %2904 = vmatpush3.bf16.msra.mxu1 %v3045_v42  ;;  %v2814_v42 = vpop.f32.mrf.mxu1 }
 0x147   : > { %2905 = vmatprep.subr.bf16.mxu1 %v3046_v60 }
 0x148   : > { %v1089_v21 = vpop.f32.mrf.mxu0  ;;  %v2816_v12 = vpop.f32.mrf.mxu1 }
 0x149   : > { %v1090_v25 = vadd.f32 %v1089_v21, %v993_v19  ;;  %v2815_v19 = vadd.f32 %v2814_v42, %v2813_v0 }
 0x14a   : > { %v1091_v3 = vpop.f32.mrf.mxu0  ;;  %2906 = vmatpush3.bf16.msra.mxu1 %v3046_v60  ;;  %v1017_v60 = vadd.f32 %v2812_v17, %v920_v13  ;;  %v2817_v16 = vpop.f32.mrf.mxu1 }
 0x14b   : > { %v1128_v44 = vpack.c.bf16 %v1090_v25, %v1087_v23  ;;  %2907 = vmatprep.subr.bf16.mxu1 %v3047_v51  ;;  %v2818_v54 = vadd.f32 %v2817_v16, %v2816_v12  ;;  %v1022_v59 = vadd.f32 %v2815_v19, %v925_v45 }
 0x14c   : > { %v1094_v7 = vpop.f32.mrf.mxu0 }
 0x14d   : > { %2888 = vmatmul.mubr.bf16.gmra.mxu1 %v1128_v44  ;;  %v1095_v29 = vadd.f32 %v1094_v7, %v998_v36  ;;  %v3048_v44 = vld [vmem:[%s4141_s3 + $0x50] sm:$0xff]   ;;  %v3051_v7 = vld [vmem:[%s4141_s3 + $0xb8] sm:$0xff]  }
 0x14e   : > { %v1096_v22 = vpop.f32.mrf.mxu0  ;;  %2908 = vmatpush3.bf16.msra.mxu1 %v3047_v51  ;;  %v928_v51 = vadd.f32 %v2754_v37, %v3542_v62  ;;  %v3049_v62 = vld [vmem:[%s4141_s3 + $0x48] sm:$0xff]   ;;  %2931 = vmatprep.subr.bf16.mxu0 %v3051_v7  ;;  %v3055_v36 = vld [vmem:[%s4141_s3 + $0x98] sm:$0xff]  }
 0x14f   : > { %2909 = vmatprep.subr.bf16.mxu1 %v3048_v44  ;;  %2932 = vmatpush3.bf16.msra.mxu0 %v3051_v7  ;;  %v3053_v22 = vld [vmem:[%s4141_s3 + $0xa8] sm:$0xff]   ;;  %v4152_v7 = vmov 0  }
 0x150   : > { %v1097_v26 = vpop.f32.mrf.mxu0  ;;  %v1025_v25 = vadd.f32 %v2818_v54, %v928_v51  ;;  %2933 = vmatprep.subr.bf16.mxu0 %v3052_v8 }
 0x151   : > { %v1098_v27 = vadd.f32 %v1097_v26, %v1001_v57  ;;  %v3056_v57 = vld [vmem:[%s4141_s3 + $0x90] sm:$0xff]  }
 0x152   : > { %v1099_v15 = vpop.f32.mrf.mxu0  ;;  %2910 = vmatpush3.bf16.msra.mxu1 %v3048_v44 }
 0x153   : > { %v1129_v47 = vpack.c.bf16 %v1098_v27, %v1095_v29  ;;  %2911 = vmatprep.subr.bf16.mxu1 %v3049_v62  ;;  %2934 = vmatpush3.bf16.msra.mxu0 %v3052_v8  ;;  %v2582_v27 = vld [vmem:[%s4142_s4] ss:$0 sm:$0xff] }
 0x154   : > { %v1102_v1 = vpop.f32.mrf.mxu0  ;;  %2935 = vmatprep.subr.bf16.mxu0 %v3053_v22  ;;  %v3058_v8 = vld [vmem:[%s4141_s3 + $0x80] sm:$0xff]  }
 0x155   : > { %2891 = vmatprep.mubr.bf16.mxu1 %v1129_v47  ;;  %v1103_v61 = vadd.f32 %v1102_v1, %v1006_v35 }
 0x156   : > { %v1104_v50 = vpop.f32.mrf.mxu0  ;;  %2912 = vmatpush3.bf16.msra.mxu1 %v3049_v62 }
 0x157   : > { %2913 = vmatprep.subr.bf16.mxu1 %v3050_v5  ;;  %2936 = vmatpush3.bf16.msra.mxu0 %v3053_v22  ;;  %v3059_v22 = vld [vmem:[%s4143_s5 + $0x150] ss:$24 sps:$4 sm:$0xff]  }
 0x158   : > { %v1105_v10 = vpop.f32.mrf.mxu0  ;;  %2937 = vmatprep.subr.bf16.mxu0 %v3054_v24 }
 0x159   : > { %v1106_v4 = vadd.f32 %v1105_v10, %v1009_v39 }
 0x15a   : > { %v1107_v30 = vpop.f32.mrf.mxu0  ;;  %2914 = vmatpush3.bf16.msra.mxu1 %v3050_v5 }
 0x15b   : > { %v1130_v33 = vpack.c.bf16 %v1106_v4, %v1103_v61  ;;  %2938 = vmatpush3.bf16.msra.mxu0 %v3054_v24  ;;  %v3061_v24 = vld [vmem:[%s4143_s5 + $0x154] ss:$24 sps:$4 sm:$0xff]  }
 0x15c   : > { %v1110_v52 = vpop.f32.mrf.mxu0  ;;  %2939 = vmatprep.subr.bf16.mxu0 %v3055_v36  ;;  %2025 = vmatprep.subr.bf16.mxu1 %v3061_v24 }
 0x15d   : > { %2892 = vmatmul.mubr.bf16.gmra.mxu1 %v1130_v33  ;;  %v1111_v20 = vadd.f32 %v1110_v52, %v1014_v38 }
 0x15e   : > { %v1112_v55 = vpop.f32.mrf.mxu0 }
 0x15f   : > { %2940 = vmatpush3.bf16.msra.mxu0 %v3055_v36  ;;  %v3064_v36 = vld [vmem:[%s4143_s5 + $0x15c] ss:$24 sps:$4 sm:$0xff]  }
 0x160   : > { %v1113_v18 = vpop.f32.mrf.mxu0  ;;  %2941 = vmatprep.subr.bf16.mxu0 %v3056_v57 }
 0x161   : > { %v1114_v14 = vadd.f32 %v1113_v18, %v1017_v60 }
 0x162   : > { %v1115_v48 = vpop.f32.mrf.mxu0 }
 0x163   : > { %v1131_v21 = vpack.c.bf16 %v1114_v14, %v1111_v20  ;;  %2942 = vmatpush3.bf16.msra.mxu0 %v3056_v57  ;;  %v3067_v57 = vld [vmem:[%s4143_s5 + $0x124] ss:$24 sps:$4 sm:$0xff]  }
 0x164   : > { %v1118_v23 = vpop.f32.mrf.mxu0  ;;  %2943 = vmatprep.subr.bf16.mxu0 %v3057_v63 }
 0x165   : > { %2895 = vmatprep.mubr.bf16.mxu1 %v1131_v21  ;;  %v1119_v3 = vadd.f32 %v1118_v23, %v1022_v59 }
 0x166   : > { %v1120_v58 = vpop.f32.mrf.mxu0 }
 0x167   : > { %2944 = vmatpush3.bf16.msra.mxu0 %v3057_v63  ;;  %v3065_v63 = vld [vmem:[%s4143_s5 + $0x120] ss:$24 sps:$4 sm:$0xff]  }
 0x168   : > { %v1121_v2 = vpop.f32.mrf.mxu0  ;;  %2945 = vmatprep.subr.bf16.mxu0 %v3058_v8 }
 0x169   : > { %v1122_v40 = vadd.f32 %v1121_v2, %v1025_v25 }
 0x16a   : > { %v1123_v41 = vpop.f32.mrf.mxu0 }
 0x16b   : > { %v1132_v43 = vpack.c.bf16 %v1122_v40, %v1119_v3  ;;  %2946 = vmatpush3.bf16.msra.mxu0 %v3058_v8 }
 0x16c   : > { %2138 = vmatprep.subr.bf16.mxu0 %v3064_v36 }
 0x16d   : > { %2896 = vmatmul.mubr.bf16.gmra.mxu1 %v1132_v43 }
 0x1fd   : > { %v2885_v26 = vpop.f32.mrf.mxu1 }
 0x1fe   : > { %v1245_v31 = vadd.f32 %v2885_v26, %v2582_v27  ;;  %v3073_v26 = vld [vmem:[%s4143_s5 + $0xf4] ss:$24 sps:$4 sm:$0xff]  }
 0x1ff   : > { %v1236_v29 = vpop.f32.mrf.mxu1 }
 0x200   : > { %v1237_v15 = vadd.f32 %v2582_v27, %v1236_v29  ;;  %v1301_v50 = vmax.f32 %v1245_v31, 0.0  ;;  %v3071_v29 = vld [vmem:[%s4143_s5 + $0xf0] ss:$24 sps:$4 sm:$0xff]  }
 0x201   : > { %v2886_v6 = vpop.f32.mrf.mxu1 }
 0x202   : > { %v1248_v28 = vadd.f32 %v2886_v6, %v2582_v27  ;;  %v1299_v1 = vmax.f32 %v1237_v15, 0.0  ;;  %v3077_v6 = vld [vmem:[%s4143_s5 + $0xc0] ss:$24 sps:$4 sm:$0xff]   ;;  %v3085_v15 = vld [vmem:[%s4143_s5 + $0x94] ss:$24 sps:$4 sm:$0xff]  }
 0x203   : > { %v1239_v46 = vpop.f32.mrf.mxu1 }
 0x204   : > { %v1240_v47 = vadd.f32 %v2582_v27, %v1239_v46  ;;  %v1302_v0 = vmax.f32 %v1248_v28, 0.0  ;;  %v3083_v28 = vld [vmem:[%s4143_s5 + $0x90] ss:$24 sps:$4 sm:$0xff]  }
 0x206   : > { %v1300_v49 = vmax.f32 %v1240_v47, 0.0  ;;  %v1316_v35 = vpack.c.bf16 %v1302_v0, %v1301_v50  ;;  %v3696_v47 = vld [vmem:[%s4142_s4 + $0x1] ss:$0 sm:$0xff] }
 0x208   : > { %v1315_v32 = vpack.c.bf16 %v1300_v49, %v1299_v1 }
 0x20a   : > { %2915 = vmatprep.mubr.bf16.mxu1 %v1315_v32 }
 0x20b   : > { %2916 = vmatmul.mubr.bf16.vlgmr.msra.gmra.mxu1 %v1316_v35 }
 0x20c   : > { %2026 = vmatpush1.bf16.msra.mxu1 %v3059_v22 }
 0x20d   : > { %v2889_v39 = vpop.f32.mrf.mxu1  ;;  %2027 = vmatprep.subr.bf16.mxu1 %v3067_v57 }
 0x20e   : > { %v1261_v11 = vadd.f32 %v2889_v39, %v2582_v27 }
 0x20f   : > { %v1252_v42 = vpop.f32.mrf.mxu1 }
 0x210   : > { %v1253_v61 = vadd.f32 %v2582_v27, %v1252_v42  ;;  %v1305_v12 = vmax.f32 %v1261_v11, 0.0  ;;  %2028 = vmatpush1.bf16.msra.mxu1 %v3065_v63  ;;  %v3062_v11 = vld [vmem:[%s4143_s5 + $0x158] ss:$24 sps:$4 sm:$0xff]  }
 0x211   : > { %v2890_v10 = vpop.f32.mrf.mxu1  ;;  %2029 = vmatprep.subr.bf16.mxu1 %v3073_v26 }
 0x212   : > { %v1264_v4 = vadd.f32 %v2890_v10, %v2582_v27  ;;  %v1303_v17 = vmax.f32 %v1253_v61, 0.0 }
 0x213   : > { %v1255_v30 = vpop.f32.mrf.mxu1 }
 0x214   : > { %v1256_v9 = vadd.f32 %v2582_v27, %v1255_v30  ;;  %v1306_v13 = vmax.f32 %v1264_v4, 0.0  ;;  %2030 = vmatpush1.bf16.msra.mxu1 %v3071_v29 }
 0x216   : > { %v1304_v33 = vmax.f32 %v1256_v9, 0.0  ;;  %v1318_v53 = vpack.c.bf16 %v1306_v13, %v1305_v12  ;;  %v3070_v9 = vld [vmem:[%s4143_s5 + $0x12c] ss:$24 sps:$4 sm:$0xff]   ;;  %v3068_v13 = vld [vmem:[%s4143_s5 + $0x128] ss:$24 sps:$4 sm:$0xff]  }
 0x218   : > { %v1317_v52 = vpack.c.bf16 %v1304_v33, %v1303_v17  ;;  %v3076_v33 = vld [vmem:[%s4143_s5 + $0xfc] ss:$24 sps:$4 sm:$0xff]  }
 0x21a   : > { %2919 = vmatprep.mubr.bf16.mxu1 %v1317_v52  ;;  %v3074_v52 = vld [vmem:[%s4143_s5 + $0xf8] ss:$24 sps:$4 sm:$0xff]  }
 0x21b   : > { %2920 = vmatmul.mubr.bf16.gmra.mxu1 %v1318_v53 }
 0x21d   : > { %v2893_v55 = vpop.f32.mrf.mxu1 }
 0x21e   : > { %v1277_v60 = vadd.f32 %v2893_v55, %v2582_v27  ;;  %v3082_v55 = vld [vmem:[%s4143_s5 + $0xcc] ss:$24 sps:$4 sm:$0xff]  }
 0x21f   : > { %v1268_v56 = vpop.f32.mrf.mxu1 }
 0x220   : > { %v1269_v37 = vadd.f32 %v2582_v27, %v1268_v56  ;;  %v1309_v48 = vmax.f32 %v1277_v60, 0.0 }
 0x221   : > { %v2894_v34 = vpop.f32.mrf.mxu1 }
 0x222   : > { %v1280_v38 = vadd.f32 %v2894_v34, %v2582_v27  ;;  %v1307_v14 = vmax.f32 %v1269_v37, 0.0 }
 0x223   : > { %v1271_v16 = vpop.f32.mrf.mxu1 }
 0x224   : > { %v1272_v18 = vadd.f32 %v2582_v27, %v1271_v16  ;;  %v1310_v20 = vmax.f32 %v1280_v38, 0.0  ;;  %v3080_v16 = vld [vmem:[%s4143_s5 + $0xc8] ss:$24 sps:$4 sm:$0xff]  }
 0x226   : > { %v1308_v45 = vmax.f32 %v1272_v18, 0.0  ;;  %v1320_v51 = vpack.c.bf16 %v1310_v20, %v1309_v48  ;;  %v3088_v20 = vld [vmem:[%s4143_s5 + $0x9c] ss:$24 sps:$4 sm:$0xff]  }
 0x228   : > { %v1319_v19 = vpack.c.bf16 %v1308_v45, %v1307_v14 }
 0x22a   : > { %2923 = vmatprep.mubr.bf16.mxu1 %v1319_v19 }
 0x22b   : > { %2924 = vmatmul.mubr.bf16.gmra.mxu1 %v1320_v51  ;;  %v3086_v51 = vld [vmem:[%s4143_s5 + $0x98] ss:$24 sps:$4 sm:$0xff]  }
 0x22d   : > { %v2897_v54 = vpop.f32.mrf.mxu1 }
 0x22e   : > { %v1293_v25 = vadd.f32 %v2897_v54, %v2582_v27 }
 0x22f   : > { %v1284_v21 = vpop.f32.mrf.mxu1 }
 0x230   : > { %v1285_v58 = vadd.f32 %v2582_v27, %v1284_v21  ;;  %v1313_v44 = vmax.f32 %v1293_v25, 0.0 }
 0x231   : > { %v2898_v23 = vpop.f32.mrf.mxu1 }
 0x232   : > { %v1296_v59 = vadd.f32 %v2898_v23, %v2582_v27  ;;  %v1311_v41 = vmax.f32 %v1285_v58, 0.0 }
 0x233   : > { %v1287_v2 = vpop.f32.mrf.mxu1 }
 0x234   : > { %v1288_v3 = vadd.f32 %v2582_v27, %v1287_v2  ;;  %v1314_v40 = vmax.f32 %v1296_v59, 0.0  ;;  %v3079_v27 = vld [vmem:[%s4143_s5 + $0xc4] ss:$24 sps:$4 sm:$0xff]  }
 0x235   : > { %2031 = vmatprep.subr.bf16.mxu1 %v3079_v27 }
 0x236   : > { %v1312_v43 = vmax.f32 %v1288_v3, 0.0  ;;  %v1322_v5 = vpack.c.bf16 %v1314_v40, %v1313_v44  ;;  %2032 = vmatpush1.bf16.msra.mxu1 %v3077_v6 }
 0x237   : > { %2033 = vmatprep.subr.bf16.mxu1 %v3085_v15 }
 0x238   : > { %v1321_v62 = vpack.c.bf16 %v1312_v43, %v1311_v41 }
 0x23a   : > { %2927 = vmatprep.mubr.bf16.mxu1 %v1321_v62  ;;  %2034 = vmatpush1.bf16.msra.mxu1 %v3083_v28 }
 0x23b   : > { %2928 = vmatmul.mubr.bf16.gmra.mxu1 %v1322_v5 }
 0x23c   : > { %2057 = vmatprep.mubr.bf16.mxu1 %v4152_v7 }
 0x2cb   : > { %v2917_v31 = vpop.f32.mrf.mxu1 }
 0x2cc   : > { %v1436_v50 = vadd.f32 %v2917_v31, %v3696_v47 }
 0x2cd   : > { %v1427_v46 = vpop.f32.mrf.mxu1 }
 0x2ce   : > { %v1428_v1 = vadd.f32 %v3696_v47, %v1427_v46  ;;  %v1492_v61 = vmax.f32 %v1436_v50, 0.0  ;;  %v3092_v50 = vld [vmem:[%s4143_s5 + $0x68] ss:$24 sps:$4 sm:$0xff]  }
 0x2cf   : > { %v2918_v0 = vpop.f32.mrf.mxu1 }
 0x2d0   : > { %v1439_v49 = vadd.f32 %v2918_v0, %v3696_v47  ;;  %v1490_v42 = vmax.f32 %v1428_v1, 0.0  ;;  %v3091_v1 = vld [vmem:[%s4143_s5 + $0x64] ss:$24 sps:$4 sm:$0xff]  }
 0x2d1   : > { %v1430_v32 = vpop.f32.mrf.mxu1  ;;  %2035 = vmatprep.subr.bf16.mxu1 %v3091_v1 }
 0x2d2   : > { %v1431_v35 = vadd.f32 %v3696_v47, %v1430_v32  ;;  %v1493_v39 = vmax.f32 %v1439_v49, 0.0  ;;  %v3094_v49 = vld [vmem:[%s4143_s5 + $0x6c] ss:$24 sps:$4 sm:$0xff]  }
 0x2d3   : > { %v3097_v32 = vld [vmem:[%s4143_s5 + $0x34] ss:$24 sps:$4 sm:$0xff]  }
 0x2d4   : > { %v1491_v10 = vmax.f32 %v1431_v35, 0.0  ;;  %v1507_v30 = vpack.c.bf16 %v1493_v39, %v1492_v61  ;;  %v3100_v35 = vld [vmem:[%s4143_s5 + $0x3c] ss:$24 sps:$4 sm:$0xff]   ;;  %v3095_v39 = vld [vmem:[%s4143_s5 + $0x30] ss:$24 sps:$4 sm:$0xff]  }
 0x2d5   : > { %v3106_v61 = vld [vmem:[%s4143_s5 + $0xc] ss:$24 sps:$4 sm:$0xff]  }
 0x2d6   : > { %v1506_v4 = vpack.c.bf16 %v1491_v10, %v1490_v42  ;;  %v3098_v42 = vld [vmem:[%s4143_s5 + $0x38] ss:$24 sps:$4 sm:$0xff]   ;;  %v3103_v10 = vld [vmem:[%s4143_s5 + $0x4] ss:$24 sps:$4 sm:$0xff]  }
 0x2d8   : > { %2947 = vmatprep.mubr.bf16.mxu0 %v1506_v4  ;;  %v3101_v4 = vld [vmem:[%s4143_s5] ss:$24 sps:$4 sm:$0xff]  }
 0x2d9   : > { %2948 = vmatmul.mubr.bf16.vlgmr.msra.gmra.mxu0 %v1507_v30  ;;  %v3109_v30 = vld [vmem:[%s4143_s5 + $0x164] ss:$24 sps:$4 sm:$0xff]  }
 0x2da   : > { %2139 = vmatpush1.bf16.msra.mxu0 %v3062_v11  ;;  %v3104_v11 = vld [vmem:[%s4143_s5 + $0x8] ss:$24 sps:$4 sm:$0xff]  }
 0x2db   : > { %v2921_v17 = vpop.f32.mrf.mxu1  ;;  %2140 = vmatprep.subr.bf16.mxu0 %v3070_v9 }
 0x2dc   : > { %v1452_v37 = vadd.f32 %v2921_v17, %v3696_v47  ;;  %v3784_v17 = vld [vmem:[%s4142_s4 + $0x2] ss:$0 sm:$0xff] }
 0x2dd   : > { %v1443_v12 = vpop.f32.mrf.mxu1 }
 0x2de   : > { %2141 = vmatpush1.bf16.msra.mxu0 %v3068_v13  ;;  %v1444_v56 = vadd.f32 %v3696_v47, %v1443_v12  ;;  %v1496_v48 = vmax.f32 %v1452_v37, 0.0 }
 0x2df   : > { %v2922_v53 = vpop.f32.mrf.mxu1  ;;  %2142 = vmatprep.subr.bf16.mxu0 %v3076_v33 }
 0x2e0   : > { %v1455_v34 = vadd.f32 %v2922_v53, %v3696_v47  ;;  %v1494_v14 = vmax.f32 %v1444_v56, 0.0 }
 0x2e1   : > { %v1446_v38 = vpop.f32.mrf.mxu1 }
 0x2e2   : > { %v1447_v60 = vadd.f32 %v3696_v47, %v1446_v38  ;;  %2143 = vmatpush1.bf16.msra.mxu0 %v3074_v52  ;;  %v1497_v18 = vmax.f32 %v1455_v34, 0.0  ;;  %v3107_v34 = vld [vmem:[%s4143_s5 + $0x160] ss:$24 sps:$4 sm:$0xff]  }
 0x2e3   : > { %2144 = vmatprep.subr.bf16.mxu0 %v3082_v55 }
 0x2e4   : > { %v1495_v45 = vmax.f32 %v1447_v60, 0.0  ;;  %v1509_v54 = vpack.c.bf16 %v1497_v18, %v1496_v48  ;;  %v3112_v60 = vld [vmem:[%s4143_s5 + $0x134] ss:$24 sps:$4 sm:$0xff]   ;;  %v3110_v18 = vld [vmem:[%s4143_s5 + $0x130] ss:$24 sps:$4 sm:$0xff]  }
 0x2e6   : > { %v1508_v19 = vpack.c.bf16 %v1495_v45, %v1494_v14  ;;  %2145 = vmatpush1.bf16.msra.mxu0 %v3080_v16  ;;  %v3115_v14 = vld [vmem:[%s4143_s5 + $0x104] ss:$24 sps:$4 sm:$0xff]  }
 0x2e7   : > { %2146 = vmatprep.subr.bf16.mxu0 %v3088_v20 }
 0x2e8   : > { %2951 = vmatprep.mubr.bf16.mxu0 %v1508_v19 }
 0x2e9   : > { %2952 = vmatmul.mubr.bf16.gmra.mxu0 %v1509_v54  ;;  %v3113_v54 = vld [vmem:[%s4143_s5 + $0x100] ss:$24 sps:$4 sm:$0xff]  }
 0x2ea   : > { %2147 = vmatpush1.bf16.msra.mxu0 %v3086_v51 }
 0x2eb   : > { %v2925_v21 = vpop.f32.mrf.mxu1  ;;  %2148 = vmatprep.subr.bf16.mxu0 %v3094_v49 }
 0x2ec   : > { %v1468_v2 = vadd.f32 %v2925_v21, %v3696_v47 }
 0x2ed   : > { %v1459_v23 = vpop.f32.mrf.mxu1 }
 0x2ee   : > { %v1460_v59 = vadd.f32 %v3696_v47, %v1459_v23  ;;  %v1500_v62 = vmax.f32 %v1468_v2, 0.0  ;;  %2149 = vmatpush1.bf16.msra.mxu0 %v3092_v50  ;;  %v3118_v23 = vld [vmem:[%s4143_s5 + $0xd4] ss:$24 sps:$4 sm:$0xff]   ;;  %v3116_v2 = vld [vmem:[%s4143_s5 + $0xd0] ss:$24 sps:$4 sm:$0xff]  }
 0x2ef   : > { %v2926_v58 = vpop.f32.mrf.mxu1  ;;  %2150 = vmatprep.subr.bf16.mxu0 %v3100_v35 }
 0x2f0   : > { %v1471_v25 = vadd.f32 %v2926_v58, %v3696_v47  ;;  %v1498_v43 = vmax.f32 %v1460_v59, 0.0 }
 0x2f1   : > { %v1462_v3 = vpop.f32.mrf.mxu1 }
 0x2f2   : > { %v1463_v40 = vadd.f32 %v3696_v47, %v1462_v3  ;;  %v1501_v41 = vmax.f32 %v1471_v25, 0.0  ;;  %2151 = vmatpush1.bf16.msra.mxu0 %v3098_v42  ;;  %v3121_v3 = vld [vmem:[%s4143_s5 + $0xa4] ss:$24 sps:$4 sm:$0xff]  }
 0x2f3   : > { %2152 = vmatprep.subr.bf16.mxu0 %v3106_v61 }
 0x2f4   : > { %v1499_v44 = vmax.f32 %v1463_v40, 0.0  ;;  %v1511_v8 = vpack.c.bf16 %v1501_v41, %v1500_v62  ;;  %v3119_v62 = vld [vmem:[%s4143_s5 + $0xa0] ss:$24 sps:$4 sm:$0xff]  }
 0x2f6   : > { %v1510_v5 = vpack.c.bf16 %v1499_v44, %v1498_v43  ;;  %2153 = vmatpush1.bf16.msra.mxu0 %v3104_v11 }
 0x2f7   : > { %2251 = vmatprep.subr.bf16.mxu0 %v3109_v30 }
 0x2f8   : > { %2955 = vmatprep.mubr.bf16.mxu0 %v1510_v5  ;;  %v3124_v5 = vld [vmem:[%s4143_s5 + $0x74] ss:$24 sps:$4 sm:$0xff]  }
 0x2f9   : > { %2956 = vmatmul.mubr.bf16.gmra.mxu0 %v1511_v8 }
 0x2fb   : > { %v2929_v22 = vpop.f32.mrf.mxu1 }
 0x2fc   : > { %v1484_v26 = vadd.f32 %v2929_v22, %v3696_v47 }
 0x2fd   : > { %v1475_v24 = vpop.f32.mrf.mxu1 }
 0x2fe   : > { %v1476_v57 = vadd.f32 %v3696_v47, %v1475_v24  ;;  %v1504_v31 = vmax.f32 %v1484_v26, 0.0  ;;  %v3122_v24 = vld [vmem:[%s4143_s5 + $0x70] ss:$24 sps:$4 sm:$0xff]  }
 0x2ff   : > { %v2930_v36 = vpop.f32.mrf.mxu1 }
 0x300   : > { %v1487_v63 = vadd.f32 %v2930_v36, %v3696_v47  ;;  %v1502_v15 = vmax.f32 %v1476_v57, 0.0  ;;  %v3127_v57 = vld [vmem:[%s4143_s5 + $0x44] ss:$24 sps:$4 sm:$0xff]  }
 0x301   : > { %v1478_v29 = vpop.f32.mrf.mxu1 }
 0x302   : > { %v1479_v27 = vadd.f32 %v3696_v47, %v1478_v29  ;;  %v1505_v6 = vmax.f32 %v1487_v63, 0.0  ;;  %v3089_v47 = vld [vmem:[%s4143_s5 + $0x60] ss:$24 sps:$4 sm:$0xff]  }
 0x303   : > { %2036 = vmatpush1.bf16.msra.mxu1 %v3089_v47 }
 0x304   : > { %v1503_v28 = vmax.f32 %v1479_v27, 0.0  ;;  %v1513_v0 = vpack.c.bf16 %v1505_v6, %v1504_v31  ;;  %2037 = vmatprep.subr.bf16.mxu1 %v3097_v32  ;;  %v3125_v27 = vld [vmem:[%s4143_s5 + $0x40] ss:$24 sps:$4 sm:$0xff]  }
 0x306   : > { %v1512_v46 = vpack.c.bf16 %v1503_v28, %v1502_v15  ;;  %v3130_v15 = vld [vmem:[%s4143_s5 + $0x14] ss:$24 sps:$4 sm:$0xff]  }
 0x307   : > { %2038 = vmatpush1.bf16.msra.mxu1 %v3095_v39 }
 0x308   : > { %2959 = vmatprep.mubr.bf16.mxu0 %v1512_v46  ;;  %2039 = vmatprep.subr.bf16.mxu1 %v3103_v10 }
 0x309   : > { %2960 = vmatmul.mubr.bf16.gmra.mxu0 %v1513_v0  ;;  %v3128_v0 = vld [vmem:[%s4143_s5 + $0x10] ss:$24 sps:$4 sm:$0xff]  }
 0x30a   : > { %2170 = vmatprep.mubr.bf16.mxu0 %v4152_v7 }
 0x30b   : > { %2040 = vmatpush1.bf16.msra.mxu1 %v3101_v4 }
 0x30c   : > { %2963 = vmatprep.subr.bf16.mxu1 %v3109_v30 }
 0x399   : > { %v2949_v9 = vpop.f32.mrf.mxu0 }
 0x39a   : > { %v1627_v16 = vadd.f32 %v2949_v9, %v3784_v17 }
 0x39b   : > { %v1618_v13 = vpop.f32.mrf.mxu0 }
 0x39c   : > { %v1619_v12 = vadd.f32 %v3784_v17, %v1618_v13  ;;  %v1683_v48 = vmax.f32 %v1627_v16, 0.0  ;;  %v3896_v16 = vld [vmem:[%s4144_s6] sm:$0x3f] }
 0x39d   : > { %v2950_v33 = vpop.f32.mrf.mxu0 }
 0x39e   : > { %v1681_v55 = vmax.f32 %v1619_v12, 0.0  ;;  %v1630_v37 = vadd.f32 %v2950_v33, %v3784_v17 }
 0x39f   : > { %v1621_v52 = vpop.f32.mrf.mxu0 }
 0x3a0   : > { %v1622_v53 = vadd.f32 %v3784_v17, %v1621_v52  ;;  %v1684_v20 = vmax.f32 %v1630_v37, 0.0 }
 0x3a2   : > { %v1682_v56 = vmax.f32 %v1622_v53, 0.0  ;;  %v3808_v51 = vpack.c.bf16 %v1684_v20, %v1683_v48 }
 0x3a4   : > { %v3792_v38 = vpack.c.bf16 %v1682_v56, %v1681_v55 }
 0x3a6   : > { %2058 = vmatmul.mubr.bf16.vlgmr.msra.gmra.mxu1 %v3792_v38  ;;  %2171 = vmatmul.mubr.bf16.vlgmr.msra.gmra.mxu0 %v3792_v38 }
 0x3a7   : > { %2971 = vmatpush1.bf16.msra.mxu1 %v3107_v34  ;;  %2067 = vmatprep.mubr.bf16.mxu1 %v4152_v7 }
 0x3a8   : > { %2180 = vmatprep.mubr.bf16.mxu0 %v4152_v7  ;;  %2964 = vmatprep.subr.bf16.mxu1 %v3112_v60 }
 0x3a9   : > { %v2953_v45 = vpop.f32.mrf.mxu0  ;;  %2252 = vmatpush1.bf16.msra.mxu0 %v3107_v34 }
 0x3aa   : > { %2253 = vmatprep.subr.bf16.mxu0 %v3112_v60  ;;  %v1643_v8 = vadd.f32 %v2953_v45, %v3784_v17 }
 0x3ab   : > { %v1634_v19 = vpop.f32.mrf.mxu0  ;;  %2972 = vmatpush1.bf16.msra.mxu1 %v3110_v18 }
 0x3ac   : > { %2965 = vmatprep.subr.bf16.mxu1 %v3115_v14  ;;  %v1635_v58 = vadd.f32 %v3784_v17, %v1634_v19  ;;  %v1687_v63 = vmax.f32 %v1643_v8, 0.0 }
 0x3ad   : > { %v2954_v21 = vpop.f32.mrf.mxu0  ;;  %2254 = vmatpush1.bf16.msra.mxu0 %v3110_v18 }
 0x3ae   : > { %2068 = vmatmul.mubr.bf16.gmra.mxu1 %v3808_v51  ;;  %2181 = vmatmul.mubr.bf16.gmra.mxu0 %v3808_v51  ;;  %v1685_v40 = vmax.f32 %v1635_v58, 0.0  ;;  %v1646_v43 = vadd.f32 %v2954_v21, %v3784_v17 }
 0x3af   : > { %v1637_v59 = vpop.f32.mrf.mxu0  ;;  %2077 = vmatprep.mubr.bf16.mxu1 %v4152_v7  ;;  %2190 = vmatprep.mubr.bf16.mxu0 %v4152_v7 }
 0x3b0   : > { %v1638_v25 = vadd.f32 %v3784_v17, %v1637_v59  ;;  %2973 = vmatpush1.bf16.msra.mxu1 %v3113_v54  ;;  %2255 = vmatprep.subr.bf16.mxu0 %v3115_v14  ;;  %v1688_v22 = vmax.f32 %v1646_v43, 0.0 }
 0x3b1   : > { %2966 = vmatprep.subr.bf16.mxu1 %v3118_v23  ;;  %2256 = vmatpush1.bf16.msra.mxu0 %v3113_v54 }
 0x3b2   : > { %v1686_v41 = vmax.f32 %v1638_v25, 0.0  ;;  %2257 = vmatprep.subr.bf16.mxu0 %v3118_v23  ;;  %v3848_v29 = vpack.c.bf16 %v1688_v22, %v1687_v63 }
 0x3b4   : > { %v3829_v44 = vpack.c.bf16 %v1686_v41, %v1685_v40  ;;  %2974 = vmatpush1.bf16.msra.mxu1 %v3116_v2 }
 0x3b5   : > { %2967 = vmatprep.subr.bf16.mxu1 %v3121_v3  ;;  %2258 = vmatpush1.bf16.msra.mxu0 %v3116_v2 }
 0x3b6   : > { %2078 = vmatmul.mubr.bf16.gmra.mxu1 %v3829_v44  ;;  %2191 = vmatmul.mubr.bf16.gmra.mxu0 %v3829_v44 }
 0x3b7   : > { %2087 = vmatprep.mubr.bf16.mxu1 %v4152_v7  ;;  %2200 = vmatprep.mubr.bf16.mxu0 %v4152_v7 }
 0x3b8   : > { %2975 = vmatpush1.bf16.msra.mxu1 %v3119_v62  ;;  %2259 = vmatprep.subr.bf16.mxu0 %v3121_v3 }
 0x3b9   : > { %v2957_v36 = vpop.f32.mrf.mxu0  ;;  %2968 = vmatprep.subr.bf16.mxu1 %v3124_v5  ;;  %2260 = vmatpush1.bf16.msra.mxu0 %v3119_v62 }
 0x3ba   : > { %2261 = vmatprep.subr.bf16.mxu0 %v3124_v5  ;;  %v1659_v32 = vadd.f32 %v2957_v36, %v3784_v17 }
 0x3bb   : > { %v1650_v26 = vpop.f32.mrf.mxu0 }
 0x3bc   : > { %2976 = vmatpush1.bf16.msra.mxu1 %v3122_v24  ;;  %v1651_v28 = vadd.f32 %v3784_v17, %v1650_v26  ;;  %v1691_v42 = vmax.f32 %v1659_v32, 0.0 }
 0x3bd   : > { %v2958_v6 = vpop.f32.mrf.mxu0  ;;  %2969 = vmatprep.subr.bf16.mxu1 %v3127_v57  ;;  %2262 = vmatpush1.bf16.msra.mxu0 %v3122_v24 }
 0x3be   : > { %2088 = vmatmul.mubr.bf16.gmra.mxu1 %v3848_v29  ;;  %2201 = vmatmul.mubr.bf16.gmra.mxu0 %v3848_v29  ;;  %v1689_v1 = vmax.f32 %v1651_v28, 0.0  ;;  %v1662_v47 = vadd.f32 %v2958_v6, %v3784_v17 }
 0x3bf   : > { %v1653_v31 = vpop.f32.mrf.mxu0  ;;  %2097 = vmatprep.mubr.bf16.mxu1 %v4152_v7  ;;  %2210 = vmatprep.mubr.bf16.mxu0 %v4152_v7 }
 0x3c0   : > { %v1654_v46 = vadd.f32 %v3784_v17, %v1653_v31  ;;  %2977 = vmatpush1.bf16.msra.mxu1 %v3125_v27  ;;  %2263 = vmatprep.subr.bf16.mxu0 %v3127_v57  ;;  %v1692_v35 = vmax.f32 %v1662_v47, 0.0 }
 0x3c1   : > { %2970 = vmatprep.subr.bf16.mxu1 %v3130_v15  ;;  %2264 = vmatpush1.bf16.msra.mxu0 %v3125_v27 }
 0x3c2   : > { %v1690_v49 = vmax.f32 %v1654_v46, 0.0  ;;  %2265 = vmatprep.subr.bf16.mxu0 %v3130_v15  ;;  %v1702_v61 = vpack.c.bf16 %v1692_v35, %v1691_v42 }
 0x3c4   : > { %v1701_v50 = vpack.c.bf16 %v1690_v49, %v1689_v1  ;;  %2978 = vmatpush1.bf16.msra.mxu1 %v3128_v0 }
 0x3c5   : > { %2266 = vmatpush1.bf16.msra.mxu0 %v3128_v0 }
 0x3c6   : > { %2098 = vmatmul.mubr.bf16.gmra.mxu1 %v1701_v50  ;;  %2211 = vmatmul.mubr.bf16.gmra.mxu0 %v1701_v50 }
 0x3c7   : > { %2107 = vmatprep.mubr.bf16.mxu1 %v4152_v7  ;;  %2220 = vmatprep.mubr.bf16.mxu0 %v4152_v7 }
 0x3c9   : > { %v2961_v39 = vpop.f32.mrf.mxu0 }
 0x3ca   : > { %v1675_v53 = vadd.f32 %v2961_v39, %v3784_v17 }
 0x3cb   : > { %v1666_v10 = vpop.f32.mrf.mxu0 }
 0x3cc   : > { %v1667_v11 = vadd.f32 %v3784_v17, %v1666_v10  ;;  %v1695_v56 = vmax.f32 %v1675_v53, 0.0 }
 0x3cd   : > { %v2962_v4 = vpop.f32.mrf.mxu0 }
 0x3ce   : > { %2108 = vmatmul.mubr.bf16.gmra.mxu1 %v1702_v61  ;;  %2221 = vmatmul.mubr.bf16.gmra.mxu0 %v1702_v61  ;;  %v1693_v13 = vmax.f32 %v1667_v11, 0.0  ;;  %v1678_v12 = vadd.f32 %v2962_v4, %v3784_v17 }
 0x3cf   : > { %v1669_v30 = vpop.f32.mrf.mxu0  ;;  %2117 = vmatprep.mubr.bf16.mxu1 %v4152_v7  ;;  %2230 = vmatprep.mubr.bf16.mxu0 %v4152_v7 }
 0x3d0   : > { %v1670_v9 = vadd.f32 %v3784_v17, %v1669_v30  ;;  %v1696_v55 = vmax.f32 %v1678_v12, 0.0  ;;  %v1755_v17 = vlaneseq }
 0x3d2   : > { %v1694_v33 = vmax.f32 %v1670_v9, 0.0  ;;  %v1704_v34 = vpack.c.bf16 %v1696_v55, %v1695_v56  ;;  %v3889_v37 = vshrl.u32 %v1755_v17, 7 }
 0x3d4   : > { %v1703_v52 = vpack.c.bf16 %v1694_v33, %v1693_v13  ;;  %v1765_v60 = vsub.s32 2, %v3889_v37  ;;  %v1761_v18 = vsub.s32 1, %v3889_v37  ;;  %v1769_v20 = vsub.s32 3, %v3889_v37 }
 0x3d6   : > { %2118 = vmatmul.mubr.bf16.gmra.mxu1 %v1703_v52  ;;  %2231 = vmatmul.mubr.bf16.gmra.mxu0 %v1703_v52  ;;  %v3907_v45 = vrot.slane %v3896_v16, %v1761_v18  ;;  %v3910_v48 = vrot.slane %v3896_v16, %v1769_v20 }
 0x3d7   : > { %2127 = vmatprep.mubr.bf16.mxu1 %v4152_v7  ;;  %2240 = vmatprep.mubr.bf16.mxu0 %v4152_v7 }
 0x3de   : > { %2128 = vmatmul.mubr.bf16.gmra.mxu1 %v1704_v34  ;;  %2241 = vmatmul.mubr.bf16.gmra.mxu0 %v1704_v34 }
 0x3df   : > { %2283 = vmatprep.mubr.bf16.mxu0 %v4152_v7  ;;  %2303 = vmatprep.mubr.bf16.mxu1 %v4152_v7 }
 0x3e6   : > { %2284 = vmatmul.mubr.bf16.vlgmr.msra.gmra.mxu0 %v3792_v38  ;;  %2304 = vmatmul.mubr.bf16.vlgmr.msra.gmra.mxu1 %v3829_v44  ;;  %v1757_v38 = vsub.s32 0, %v3889_v37 }
 0x3e7   : > { %2293 = vmatprep.mubr.bf16.mxu0 %v4152_v7  ;;  %2313 = vmatprep.mubr.bf16.mxu1 %v4152_v7 }
 0x3e8   : > { %v3901_v14 = vrot.slane %v3896_v16, %v1757_v38 }
 0x3ee   : > { %2294 = vmatmul.mubr.bf16.gmra.mxu0 %v3808_v51  ;;  %2314 = vmatmul.mubr.bf16.gmra.mxu1 %v3848_v29 }
 0x3ef   : > { %2323 = vmatprep.mubr.bf16.mxu1 %v4152_v7 }
 0x3f6   : > { %2324 = vmatmul.mubr.bf16.gmra.mxu1 %v1701_v50 }
 0x3f7   : > { %2333 = vmatprep.mubr.bf16.mxu1 %v4152_v7 }
 0x3fe   : > { %2334 = vmatmul.mubr.bf16.gmra.mxu1 %v1702_v61 }
 0x3ff   : > { %2343 = vmatprep.mubr.bf16.mxu1 %v4152_v7 }
 0x406   : > { %2344 = vmatmul.mubr.bf16.gmra.mxu1 %v1703_v52 }
 0x407   : > { %2353 = vmatprep.mubr.bf16.mxu1 %v4152_v7  ;;  %v3904_v7 = vrot.slane %v3896_v16, %v1765_v60 }
 0x40e   : > { %2354 = vmatmul.mubr.bf16.gmra.mxu1 %v1704_v34 }
 0x466   : > { %v2059_v19 = vpop.f32.mrf.mxu1  ;;  %v2172_v51 = vpop.f32.mrf.mxu0 }
 0x467   : > { %v2060_v54 = vadd.f32 %v2059_v19, %v3901_v14  ;;  %v2173_v21 = vadd.f32 %v2172_v51, %v3904_v7 }
 0x468   : > { %v2061_v23 = vpop.f32.mrf.mxu1  ;;  %v2174_v58 = vpop.f32.mrf.mxu0 }
 0x469   : > { %2364 = vst [vmem:[%s3917_s15] sm:$0xff] %v2060_v54  ;;  %2366 = vst [vmem:[%s3917_s15 + $0x10] sm:$0xff] %v2173_v21  ;;  %v2062_v59 = vadd.f32 %v2061_v23, %v3907_v45  ;;  %v2175_v25 = vadd.f32 %v2174_v58, %v3910_v48 }
 0x46a   : > { %v2063_v2 = vpop.f32.mrf.mxu1  ;;  %v2176_v3 = vpop.f32.mrf.mxu0 }
 0x46b   : > { %2365 = vst [vmem:[%s3917_s15 + $0x8] sm:$0xff] %v2062_v59  ;;  %2367 = vst [vmem:[%s3917_s15 + $0x18] sm:$0xff] %v2175_v25  ;;  %v2064_v40 = vadd.f32 %v2063_v2, %v3901_v14  ;;  %v2177_v41 = vadd.f32 %v2176_v3, %v3904_v7 }
 0x46c   : > { %v2065_v43 = vpop.f32.mrf.mxu1  ;;  %v2178_v44 = vpop.f32.mrf.mxu0 }
 0x46d   : > { %2370 = vst [vmem:[%s3917_s15 + $0x30] sm:$0xff] %v2064_v40  ;;  %2372 = vst [vmem:[%s3917_s15 + $0x40] sm:$0xff] %v2177_v41  ;;  %v2066_v62 = vadd.f32 %v2065_v43, %v3907_v45  ;;  %v2179_v5 = vadd.f32 %v2178_v44, %v3910_v48 }
 0x46e   : > { %v2069_v8 = vpop.f32.mrf.mxu1  ;;  %v2182_v22 = vpop.f32.mrf.mxu0 }
 0x46f   : > { %2371 = vst [vmem:[%s3917_s15 + $0x38] sm:$0xff] %v2066_v62  ;;  %2373 = vst [vmem:[%s3917_s15 + $0x48] sm:$0xff] %v2179_v5  ;;  %v2070_v24 = vadd.f32 %v2069_v8, %v3901_v14  ;;  %v2183_v36 = vadd.f32 %v2182_v22, %v3904_v7 }
 0x470   : > { %v2071_v57 = vpop.f32.mrf.mxu1  ;;  %v2184_v63 = vpop.f32.mrf.mxu0 }
 0x471   : > { %2376 = vst [vmem:[%s3917_s15 + $0x60] sm:$0xff] %v2070_v24  ;;  %2378 = vst [vmem:[%s3917_s15 + $0x70] sm:$0xff] %v2183_v36  ;;  %v2072_v26 = vadd.f32 %v2071_v57, %v3907_v45  ;;  %v2185_v29 = vadd.f32 %v2184_v63, %v3910_v48 }
 0x472   : > { %v2073_v27 = vpop.f32.mrf.mxu1  ;;  %v2186_v6 = vpop.f32.mrf.mxu0 }
 0x473   : > { %2377 = vst [vmem:[%s3917_s15 + $0x68] sm:$0xff] %v2072_v26  ;;  %2379 = vst [vmem:[%s3917_s15 + $0x78] sm:$0xff] %v2185_v29  ;;  %v2074_v15 = vadd.f32 %v2073_v27, %v3901_v14  ;;  %v2187_v28 = vadd.f32 %v2186_v6, %v3904_v7 }
 0x474   : > { %v2075_v31 = vpop.f32.mrf.mxu1  ;;  %v2188_v46 = vpop.f32.mrf.mxu0 }
 0x475   : > { %2382 = vst [vmem:[%s3917_s15 + $0x90] sm:$0xff] %v2074_v15  ;;  %2384 = vst [vmem:[%s3917_s15 + $0xa0] sm:$0xff] %v2187_v28  ;;  %v2076_v0 = vadd.f32 %v2075_v31, %v3907_v45  ;;  %v2189_v1 = vadd.f32 %v2188_v46, %v3910_v48 }
 0x476   : > { %v2079_v49 = vpop.f32.mrf.mxu1  ;;  %v2192_v47 = vpop.f32.mrf.mxu0 }
 0x477   : > { %2383 = vst [vmem:[%s3917_s15 + $0x98] sm:$0xff] %v2076_v0  ;;  %2385 = vst [vmem:[%s3917_s15 + $0xa8] sm:$0xff] %v2189_v1  ;;  %v2080_v50 = vadd.f32 %v2079_v49, %v3901_v14  ;;  %v2193_v32 = vadd.f32 %v2192_v47, %v3904_v7 }
 0x478   : > { %v2081_v35 = vpop.f32.mrf.mxu1  ;;  %v2194_v39 = vpop.f32.mrf.mxu0 }
 0x479   : > { %2388 = vst [vmem:[%s3917_s15 + $0xc0] sm:$0xff] %v2080_v50  ;;  %2390 = vst [vmem:[%s3917_s15 + $0xd0] sm:$0xff] %v2193_v32  ;;  %v2082_v42 = vadd.f32 %v2081_v35, %v3907_v45  ;;  %v2195_v10 = vadd.f32 %v2194_v39, %v3910_v48 }
 0x47a   : > { %v2083_v61 = vpop.f32.mrf.mxu1  ;;  %v2196_v4 = vpop.f32.mrf.mxu0 }
 0x47b   : > { %2389 = vst [vmem:[%s3917_s15 + $0xc8] sm:$0xff] %v2082_v42  ;;  %2391 = vst [vmem:[%s3917_s15 + $0xd8] sm:$0xff] %v2195_v10  ;;  %v2084_v11 = vadd.f32 %v2083_v61, %v3901_v14  ;;  %v2197_v30 = vadd.f32 %v2196_v4, %v3904_v7 }
 0x47c   : > { %v2085_v9 = vpop.f32.mrf.mxu1  ;;  %v2198_v13 = vpop.f32.mrf.mxu0 }
 0x47d   : > { %2394 = vst [vmem:[%s3917_s15 + $0xf0] sm:$0xff] %v2084_v11  ;;  %2396 = vst [vmem:[%s3917_s15 + $0x100] sm:$0xff] %v2197_v30  ;;  %v2086_v33 = vadd.f32 %v2085_v9, %v3907_v45  ;;  %v2199_v12 = vadd.f32 %v2198_v13, %v3910_v48 }
 0x47e   : > { %v2089_v52 = vpop.f32.mrf.mxu1  ;;  %v2202_v53 = vpop.f32.mrf.mxu0 }
 0x47f   : > { %2395 = vst [vmem:[%s3917_s15 + $0xf8] sm:$0xff] %v2086_v33  ;;  %2397 = vst [vmem:[%s3917_s15 + $0x108] sm:$0xff] %v2199_v12  ;;  %v2090_v55 = vadd.f32 %v2089_v52, %v3901_v14  ;;  %v2203_v56 = vadd.f32 %v2202_v53, %v3904_v7 }
 0x480   : > { %v2091_v34 = vpop.f32.mrf.mxu1  ;;  %v2204_v17 = vpop.f32.mrf.mxu0 }
 0x481   : > { %2400 = vst [vmem:[%s3917_s15 + $0x120] sm:$0xff] %v2090_v55  ;;  %2402 = vst [vmem:[%s3917_s15 + $0x130] sm:$0xff] %v2203_v56  ;;  %v2092_v38 = vadd.f32 %v2091_v34, %v3907_v45  ;;  %v2205_v60 = vadd.f32 %v2204_v17, %v3910_v48 }
 0x482   : > { %v2093_v18 = vpop.f32.mrf.mxu1  ;;  %v2206_v20 = vpop.f32.mrf.mxu0 }
 0x483   : > { %2401 = vst [vmem:[%s3917_s15 + $0x128] sm:$0xff] %v2092_v38  ;;  %2403 = vst [vmem:[%s3917_s15 + $0x138] sm:$0xff] %v2205_v60  ;;  %v2094_v19 = vadd.f32 %v2093_v18, %v3901_v14  ;;  %v2207_v51 = vadd.f32 %v2206_v20, %v3904_v7 }
 0x484   : > { %v2095_v54 = vpop.f32.mrf.mxu1  ;;  %v2208_v21 = vpop.f32.mrf.mxu0 }
 0x485   : > { %2406 = vst [vmem:[%s3917_s15 + $0x150] sm:$0xff] %v2094_v19  ;;  %2408 = vst [vmem:[%s3917_s15 + $0x160] sm:$0xff] %v2207_v51  ;;  %v2096_v23 = vadd.f32 %v2095_v54, %v3907_v45  ;;  %v2209_v58 = vadd.f32 %v2208_v21, %v3910_v48  ;;  %v1773_v19 = vsub.s32 4, %v3889_v37 }
 0x486   : > { %v2099_v59 = vpop.f32.mrf.mxu1  ;;  %v2212_v25 = vpop.f32.mrf.mxu0 }
 0x487   : > { %2407 = vst [vmem:[%s3917_s15 + $0x158] sm:$0xff] %v2096_v23  ;;  %2409 = vst [vmem:[%s3917_s15 + $0x168] sm:$0xff] %v2209_v58  ;;  %v2100_v2 = vadd.f32 %v2099_v59, %v3901_v14  ;;  %v2213_v3 = vadd.f32 %v2212_v25, %v3904_v7  ;;  %v1777_v58 = vsub.s32 5, %v3889_v37 }
 0x488   : > { %v2101_v40 = vpop.f32.mrf.mxu1  ;;  %v2214_v41 = vpop.f32.mrf.mxu0 }
 0x489   : > { %2412 = vst [vmem:[%s3917_s15 + $0x180] sm:$0xff] %v2100_v2  ;;  %2414 = vst [vmem:[%s3917_s15 + $0x190] sm:$0xff] %v2213_v3  ;;  %v2102_v43 = vadd.f32 %v2101_v40, %v3907_v45  ;;  %v2215_v44 = vadd.f32 %v2214_v41, %v3910_v48  ;;  %v4044_v40 = vrot.slane %v3896_v16, %v1773_v19 }
 0x48a   : > { %v2103_v62 = vpop.f32.mrf.mxu1  ;;  %v2216_v5 = vpop.f32.mrf.mxu0 }
 0x48b   : > { %2413 = vst [vmem:[%s3917_s15 + $0x188] sm:$0xff] %v2102_v43  ;;  %2415 = vst [vmem:[%s3917_s15 + $0x198] sm:$0xff] %v2215_v44  ;;  %v2104_v8 = vadd.f32 %v2103_v62, %v3901_v14  ;;  %v2217_v22 = vadd.f32 %v2216_v5, %v3904_v7  ;;  %v4051_v62 = vrot.slane %v3896_v16, %v1777_v58 }
 0x48c   : > { %v2105_v24 = vpop.f32.mrf.mxu1  ;;  %v2218_v36 = vpop.f32.mrf.mxu0 }
 0x48d   : > { %2418 = vst [vmem:[%s3917_s15 + $0x1b0] sm:$0xff] %v2104_v8  ;;  %2420 = vst [vmem:[%s3917_s15 + $0x1c0] sm:$0xff] %v2217_v22  ;;  %v2106_v57 = vadd.f32 %v2105_v24, %v3907_v45  ;;  %v2219_v63 = vadd.f32 %v2218_v36, %v3910_v48 }
 0x48e   : > { %v2109_v26 = vpop.f32.mrf.mxu1  ;;  %v2222_v29 = vpop.f32.mrf.mxu0 }
 0x48f   : > { %2419 = vst [vmem:[%s3917_s15 + $0x1b8] sm:$0xff] %v2106_v57  ;;  %2421 = vst [vmem:[%s3917_s15 + $0x1c8] sm:$0xff] %v2219_v63  ;;  %v2110_v27 = vadd.f32 %v2109_v26, %v3901_v14  ;;  %v2223_v6 = vadd.f32 %v2222_v29, %v3904_v7 }
 0x490   : > { %v2111_v15 = vpop.f32.mrf.mxu1  ;;  %v2224_v28 = vpop.f32.mrf.mxu0 }
 0x491   : > { %2424 = vst [vmem:[%s3917_s15 + $0x1e0] sm:$0xff] %v2110_v27  ;;  %2426 = vst [vmem:[%s3917_s15 + $0x1f0] sm:$0xff] %v2223_v6  ;;  %v2112_v31 = vadd.f32 %v2111_v15, %v3907_v45  ;;  %v2225_v46 = vadd.f32 %v2224_v28, %v3910_v48 }
 0x492   : > { %v2113_v0 = vpop.f32.mrf.mxu1  ;;  %v2226_v1 = vpop.f32.mrf.mxu0 }
 0x493   : > { %2425 = vst [vmem:[%s3917_s15 + $0x1e8] sm:$0xff] %v2112_v31  ;;  %2427 = vst [vmem:[%s3917_s15 + $0x1f8] sm:$0xff] %v2225_v46  ;;  %v2114_v49 = vadd.f32 %v2113_v0, %v3901_v14  ;;  %v2227_v47 = vadd.f32 %v2226_v1, %v3904_v7 }
 0x494   : > { %v2115_v50 = vpop.f32.mrf.mxu1  ;;  %v2228_v32 = vpop.f32.mrf.mxu0 }
 0x495   : > { %2430 = vst [vmem:[%s3917_s15 + $0x210] sm:$0xff] %v2114_v49  ;;  %2432 = vst [vmem:[%s3917_s15 + $0x220] sm:$0xff] %v2227_v47  ;;  %v2116_v35 = vadd.f32 %v2115_v50, %v3907_v45  ;;  %v2229_v39 = vadd.f32 %v2228_v32, %v3910_v48 }
 0x496   : > { %v2119_v42 = vpop.f32.mrf.mxu1  ;;  %v2232_v10 = vpop.f32.mrf.mxu0 }
 0x497   : > { %2431 = vst [vmem:[%s3917_s15 + $0x218] sm:$0xff] %v2116_v35  ;;  %2433 = vst [vmem:[%s3917_s15 + $0x228] sm:$0xff] %v2229_v39  ;;  %v2120_v61 = vadd.f32 %v2119_v42, %v3901_v14  ;;  %v2233_v4 = vadd.f32 %v2232_v10, %v3904_v7 }
 0x498   : > { %v2121_v11 = vpop.f32.mrf.mxu1  ;;  %v2234_v30 = vpop.f32.mrf.mxu0 }
 0x499   : > { %2436 = vst [vmem:[%s3917_s15 + $0x240] sm:$0xff] %v2120_v61  ;;  %2438 = vst [vmem:[%s3917_s15 + $0x250] sm:$0xff] %v2233_v4  ;;  %v2122_v9 = vadd.f32 %v2121_v11, %v3907_v45  ;;  %v2235_v13 = vadd.f32 %v2234_v30, %v3910_v48 }
 0x49a   : > { %v2123_v33 = vpop.f32.mrf.mxu1  ;;  %v2236_v12 = vpop.f32.mrf.mxu0 }
 0x49b   : > { %2437 = vst [vmem:[%s3917_s15 + $0x248] sm:$0xff] %v2122_v9  ;;  %2439 = vst [vmem:[%s3917_s15 + $0x258] sm:$0xff] %v2235_v13  ;;  %v2124_v52 = vadd.f32 %v2123_v33, %v3901_v14  ;;  %v2237_v53 = vadd.f32 %v2236_v12, %v3904_v7 }
 0x49c   : > { %v2125_v55 = vpop.f32.mrf.mxu1  ;;  %v2238_v56 = vpop.f32.mrf.mxu0 }
 0x49d   : > { %2442 = vst [vmem:[%s3917_s15 + $0x270] sm:$0xff] %v2124_v52  ;;  %2444 = vst [vmem:[%s3917_s15 + $0x280] sm:$0xff] %v2237_v53  ;;  %v2126_v34 = vadd.f32 %v2125_v55, %v3907_v45  ;;  %v2239_v17 = vadd.f32 %v2238_v56, %v3910_v48 }
 0x49e   : > { %v2129_v38 = vpop.f32.mrf.mxu1  ;;  %v2242_v60 = vpop.f32.mrf.mxu0 }
 0x49f   : > { %2443 = vst [vmem:[%s3917_s15 + $0x278] sm:$0xff] %v2126_v34  ;;  %2445 = vst [vmem:[%s3917_s15 + $0x288] sm:$0xff] %v2239_v17  ;;  %v2130_v18 = vadd.f32 %v2129_v38, %v3901_v14  ;;  %v2243_v20 = vadd.f32 %v2242_v60, %v3904_v7 }
 0x4a0   : > { %v2131_v51 = vpop.f32.mrf.mxu1  ;;  %v2244_v54 = vpop.f32.mrf.mxu0 }
 0x4a1   : > { %2448 = vst [vmem:[%s3917_s15 + $0x2a0] sm:$0xff] %v2130_v18  ;;  %2450 = vst [vmem:[%s3917_s15 + $0x2b0] sm:$0xff] %v2243_v20  ;;  %v2132_v21 = vadd.f32 %v2131_v51, %v3907_v45  ;;  %v2245_v23 = vadd.f32 %v2244_v54, %v3910_v48 }
 0x4a2   : > { %v2133_v59 = vpop.f32.mrf.mxu1  ;;  %v2246_v25 = vpop.f32.mrf.mxu0 }
 0x4a3   : > { %2449 = vst [vmem:[%s3917_s15 + $0x2a8] sm:$0xff] %v2132_v21  ;;  %2451 = vst [vmem:[%s3917_s15 + $0x2b8] sm:$0xff] %v2245_v23  ;;  %v2134_v2 = vadd.f32 %v2133_v59, %v3901_v14  ;;  %v2247_v3 = vadd.f32 %v2246_v25, %v3904_v7 }
 0x4a4   : > { %v2135_v41 = vpop.f32.mrf.mxu1  ;;  %v2248_v43 = vpop.f32.mrf.mxu0 }
 0x4a5   : > { %2454 = vst [vmem:[%s3917_s15 + $0x2d0] sm:$0xff] %v2134_v2  ;;  %2456 = vst [vmem:[%s3917_s15 + $0x2e0] sm:$0xff] %v2247_v3  ;;  %v2136_v37 = vadd.f32 %v2135_v41, %v3907_v45  ;;  %v2249_v44 = vadd.f32 %v2248_v43, %v3910_v48 }
 0x4a6   : > { %v2285_v14 = vpop.f32.mrf.mxu0  ;;  %v2305_v7 = vpop.f32.mrf.mxu1 }
 0x4a7   : > { %2455 = vst [vmem:[%s3917_s15 + $0x2d8] sm:$0xff] %v2136_v37  ;;  %2457 = vst [vmem:[%s3917_s15 + $0x2e8] sm:$0xff] %v2249_v44  ;;  %v2286_v5 = vadd.f32 %v2285_v14, %v4044_v40  ;;  %v2306_v8 = vadd.f32 %v2305_v7, %v4044_v40 }
 0x4a8   : > { %v2287_v22 = vpop.f32.mrf.mxu0  ;;  %v2307_v24 = vpop.f32.mrf.mxu1 }
 0x4a9   : > { %2368 = vst [vmem:[%s3917_s15 + $0x20] sm:$0xff] %v2286_v5  ;;  %2392 = vst [vmem:[%s3917_s15 + $0xe0] sm:$0xff] %v2306_v8  ;;  %v2288_v45 = vadd.f32 %v2287_v22, %v4051_v62  ;;  %v2308_v16 = vadd.f32 %v2307_v24, %v4051_v62 }
 0x4aa   : > { %v2289_v48 = vpop.f32.mrf.mxu0  ;;  %v2309_v36 = vpop.f32.mrf.mxu1 }
 0x4ab   : > { %2369 = vst.msk [vmem:[%s3917_s15 + $0x28] sm:$0xff] %vm803_vm1, %v2288_v45  ;;  %2393 = vst.msk [vmem:[%s3917_s15 + $0xe8] sm:$0xff] %vm803_vm1, %v2308_v16  ;;  %v2290_v57 = vadd.f32 %v2289_v48, %v4044_v40  ;;  %v2310_v63 = vadd.f32 %v2309_v36, %v4044_v40 }
 0x4ac   : > { %v2291_v26 = vpop.f32.mrf.mxu0  ;;  %v2311_v29 = vpop.f32.mrf.mxu1 }
 0x4ad   : > { %2374 = vst [vmem:[%s3917_s15 + $0x50] sm:$0xff] %v2290_v57  ;;  %2398 = vst [vmem:[%s3917_s15 + $0x110] sm:$0xff] %v2310_v63  ;;  %v2292_v27 = vadd.f32 %v2291_v26, %v4051_v62  ;;  %v2312_v6 = vadd.f32 %v2311_v29, %v4051_v62 }
 0x4ae   : > { %v2295_v15 = vpop.f32.mrf.mxu0  ;;  %v2315_v28 = vpop.f32.mrf.mxu1 }
 0x4af   : > { %2375 = vst.msk [vmem:[%s3917_s15 + $0x58] sm:$0xff] %vm803_vm1, %v2292_v27  ;;  %2399 = vst.msk [vmem:[%s3917_s15 + $0x118] sm:$0xff] %vm803_vm1, %v2312_v6  ;;  %v2296_v31 = vadd.f32 %v2295_v15, %v4044_v40  ;;  %v2316_v46 = vadd.f32 %v2315_v28, %v4044_v40 }
 0x4b0   : > { %v2297_v0 = vpop.f32.mrf.mxu0  ;;  %v2317_v1 = vpop.f32.mrf.mxu1 }
 0x4b1   : > { %2380 = vst [vmem:[%s3917_s15 + $0x80] sm:$0xff] %v2296_v31  ;;  %2404 = vst [vmem:[%s3917_s15 + $0x140] sm:$0xff] %v2316_v46  ;;  %v2298_v49 = vadd.f32 %v2297_v0, %v4051_v62  ;;  %v2318_v47 = vadd.f32 %v2317_v1, %v4051_v62 }
 0x4b2   : > { %v2299_v50 = vpop.f32.mrf.mxu0  ;;  %v2319_v32 = vpop.f32.mrf.mxu1 }
 0x4b3   : > { %2381 = vst.msk [vmem:[%s3917_s15 + $0x88] sm:$0xff] %vm803_vm1, %v2298_v49  ;;  %2405 = vst.msk [vmem:[%s3917_s15 + $0x148] sm:$0xff] %vm803_vm1, %v2318_v47  ;;  %v2300_v35 = vadd.f32 %v2299_v50, %v4044_v40  ;;  %v2320_v39 = vadd.f32 %v2319_v32, %v4044_v40 }
 0x4b4   : > { %v2301_v42 = vpop.f32.mrf.mxu0  ;;  %v2321_v10 = vpop.f32.mrf.mxu1 }
 0x4b5   : > { %2386 = vst [vmem:[%s3917_s15 + $0xb0] sm:$0xff] %v2300_v35  ;;  %2410 = vst [vmem:[%s3917_s15 + $0x170] sm:$0xff] %v2320_v39  ;;  %v2302_v61 = vadd.f32 %v2301_v42, %v4051_v62  ;;  %v2322_v4 = vadd.f32 %v2321_v10, %v4051_v62 }
 0x4b6   : > { %v2325_v11 = vpop.f32.mrf.mxu1 }
 0x4b7   : > { %2387 = vst.msk [vmem:[%s3917_s15 + $0xb8] sm:$0xff] %vm803_vm1, %v2302_v61  ;;  %2411 = vst.msk [vmem:[%s3917_s15 + $0x178] sm:$0xff] %vm803_vm1, %v2322_v4  ;;  %v2326_v30 = vadd.f32 %v2325_v11, %v4044_v40 }
 0x4b8   : > { %v2327_v9 = vpop.f32.mrf.mxu1 }
 0x4b9   : > { %2416 = vst [vmem:[%s3917_s15 + $0x1a0] sm:$0xff] %v2326_v30  ;;  %v2328_v13 = vadd.f32 %v2327_v9, %v4051_v62 }
 0x4ba   : > { %v2329_v33 = vpop.f32.mrf.mxu1 }
 0x4bb   : > { %2417 = vst.msk [vmem:[%s3917_s15 + $0x1a8] sm:$0xff] %vm803_vm1, %v2328_v13  ;;  %v2330_v12 = vadd.f32 %v2329_v33, %v4044_v40 }
 0x4bc   : > { %v2331_v52 = vpop.f32.mrf.mxu1 }
 0x4bd   : > { %2422 = vst [vmem:[%s3917_s15 + $0x1d0] sm:$0xff] %v2330_v12  ;;  %v2332_v53 = vadd.f32 %v2331_v52, %v4051_v62 }
 0x4be   : > { %v2335_v55 = vpop.f32.mrf.mxu1 }
 0x4bf   : > { %2423 = vst.msk [vmem:[%s3917_s15 + $0x1d8] sm:$0xff] %vm803_vm1, %v2332_v53  ;;  %v2336_v56 = vadd.f32 %v2335_v55, %v4044_v40 }
 0x4c0   : > { %v2337_v34 = vpop.f32.mrf.mxu1 }
 0x4c1   : > { %2428 = vst [vmem:[%s3917_s15 + $0x200] sm:$0xff] %v2336_v56  ;;  %v2338_v17 = vadd.f32 %v2337_v34, %v4051_v62 }
 0x4c2   : > { %v2339_v38 = vpop.f32.mrf.mxu1 }
 0x4c3   : > { %2429 = vst.msk [vmem:[%s3917_s15 + $0x208] sm:$0xff] %vm803_vm1, %v2338_v17  ;;  %v2340_v60 = vadd.f32 %v2339_v38, %v4044_v40 }
 0x4c4   : > { %v2341_v18 = vpop.f32.mrf.mxu1 }
 0x4c5   : > { %2434 = vst [vmem:[%s3917_s15 + $0x230] sm:$0xff] %v2340_v60  ;;  %v2342_v20 = vadd.f32 %v2341_v18, %v4051_v62 }
 0x4c6   : > { %v2345_v19 = vpop.f32.mrf.mxu1 }
 0x4c7   : > { %2435 = vst.msk [vmem:[%s3917_s15 + $0x238] sm:$0xff] %vm803_vm1, %v2342_v20  ;;  %v2346_v51 = vadd.f32 %v2345_v19, %v4044_v40 }
 0x4c8   : > { %v2347_v54 = vpop.f32.mrf.mxu1 }
 0x4c9   : > { %2440 = vst [vmem:[%s3917_s15 + $0x260] sm:$0xff] %v2346_v51  ;;  %v2348_v21 = vadd.f32 %v2347_v54, %v4051_v62 }
 0x4ca   : > { %v2349_v23 = vpop.f32.mrf.mxu1 }
 0x4cb   : > { %2441 = vst.msk [vmem:[%s3917_s15 + $0x268] sm:$0xff] %vm803_vm1, %v2348_v21  ;;  %v2350_v58 = vadd.f32 %v2349_v23, %v4044_v40 }
 0x4cc   : > { %v2351_v59 = vpop.f32.mrf.mxu1 }
 0x4cd   : > { %2446 = vst [vmem:[%s3917_s15 + $0x290] sm:$0xff] %v2350_v58  ;;  %v2352_v25 = vadd.f32 %v2351_v59, %v4051_v62 }
 0x4ce   : > { %v2355_v2 = vpop.f32.mrf.mxu1 }
 0x4cf   : > { %2447 = vst.msk [vmem:[%s3917_s15 + $0x298] sm:$0xff] %vm803_vm1, %v2352_v25  ;;  %v2356_v3 = vadd.f32 %v2355_v2, %v4044_v40 }
 0x4d0   : > { %v2357_v41 = vpop.f32.mrf.mxu1 }
 0x4d1   : > { %2452 = vst [vmem:[%s3917_s15 + $0x2c0] sm:$0xff] %v2356_v3  ;;  %v2358_v43 = vadd.f32 %v2357_v41, %v4051_v62 }
 0x4d2   : > { %v2359_v37 = vpop.f32.mrf.mxu1 }
 0x4d3   : > { %2453 = vst.msk [vmem:[%s3917_s15 + $0x2c8] sm:$0xff] %vm803_vm1, %v2358_v43  ;;  %v2360_v44 = vadd.f32 %v2359_v37, %v4044_v40 }
 0x4d4   : > { %v2361_v14 = vpop.f32.mrf.mxu1 }
 0x4d5   : > { %2458 = vst [vmem:[%s3917_s15 + $0x2f0] sm:$0xff] %v2360_v44  ;;  %v2362_v7 = vadd.f32 %v2361_v14, %v4051_v62 }
 0x4d7   : > { %2459 = vst.msk [vmem:[%s3917_s15 + $0x2f8] sm:$0xff] %vm803_vm1, %v2362_v7 }
 0x4d8 PF: > { %s17_s24 = sadd.s32 1, %s3137_s24  }
 0x4d9   : > { %p14_p4 = scmp.ge.s32.totalorder %s17_s24, 4  }
 0x4db   :  { %16 = sbr.rel (!%p14_p4) target bundleno = 1 (0x1), region = 80 }

</bundles_post_ra>
